<compile_context>
chip_gen: v7x
topology: tpu7x:2x2x1
jax: 0.10.0
libtpu: 0.0.40
codegen_flags: <defaults>
</compile_context>

<pallas_src>
import jax
import jax.numpy as jnp
from jax.experimental import pallas as pl
from jax.experimental.pallas import tpu as pltpu


IN_SIZE = 27     # one-hot char encoding width (module constant)
N_LETTERS = 26   # alphabet size (module constant)
IN_PAD = 32      # 27 -> 32 input one-hot dim
G_PAD = 32       # 26 -> 32 guessed-letters dim
OUT_PAD = 128    # 26 -> 128 output dim (full lane width -> unmasked vst)
NEG_BIG = -1e30  # bias for padded output columns -> exp() underflows to exactly 0


def mary_lstm_kernel(x_ref, guessed_ref,
                     wih_ref, whh_ref, b_ref,
                     wch_ref, wcg_ref, bc_ref,
                     wo_ref, bo_ref,
                     out_ref):
    """Forward pass for one batch tile, fully resident in VMEM."""
    T = x_ref.shape[0]
    TB = x_ref.shape[1]
    H = whh_ref.shape[0]

    whh = whh_ref[...]                       # bf16 (H, 4H), loaded once

    # ---- Fused input projection (off the serial chain) --------------------
    # (T, TB, IN_PAD) -> (T*TB, IN_PAD) is pure sublane stacking (TB % 8 == 0).
    # One matmul against w_ih, bias broadcast folded in once (hoisted; JAX does
    # not CSE broadcast_in_dim inside the loop).
    x2d = x_ref[...].reshape(T * TB, x_ref.shape[2]).astype(jnp.bfloat16)
    xg_all = (jnp.dot(x2d, wih_ref[...], preferred_element_type=jnp.float32)
              + jnp.broadcast_to(b_ref[...], (T * TB, 4 * H)))

    # ---- LSTM recurrence: fully unrolled (T small & static) ---------------
    h = jnp.zeros((TB, H), jnp.float32)
    c = jnp.zeros((TB, H), jnp.float32)
    for t in range(T):
        gates = (xg_all[t * TB:(t + 1) * TB, :]
                 + jnp.dot(h.astype(jnp.bfloat16), whh,
                           preferred_element_type=jnp.float32))
        # PyTorch LSTM gate ordering: i, f, g, o.
        # Gate nonlinearities kept f32 (portable to v5e; bf16 EUP gates are a
        # v6e/v7x-only micro-lever).
        i_g = jax.nn.sigmoid(gates[:, 0 * H:1 * H])
        f_g = jax.nn.sigmoid(gates[:, 1 * H:2 * H])
        g_g = jnp.tanh(gates[:, 2 * H:3 * H])
        o_g = jax.nn.sigmoid(gates[:, 3 * H:4 * H])
        c = f_g * c + i_g * g_g
        h = o_g * jnp.tanh(c)

    # ---- Head: relu(Linear(cat([h, guessed]))) -> softmax(Linear) ---------
    # concat+Linear split algebraically: h @ Wc_h + g @ Wc_g + bc
    hidden = (jnp.dot(h.astype(jnp.bfloat16), wch_ref[...],
                      preferred_element_type=jnp.float32)
              + jnp.dot(guessed_ref[...].astype(jnp.bfloat16), wcg_ref[...],
                        preferred_element_type=jnp.float32)
              + bc_ref[...])
    hidden = jnp.maximum(hidden, 0.0)                       # ReLU

    logits = (jnp.dot(hidden.astype(jnp.bfloat16), wo_ref[...],
                      preferred_element_type=jnp.float32)
              + bo_ref[...])          # (TB, OUT_PAD); padded cols carry -1e30

    # Numerically-stable softmax; padded columns contribute exactly 0.
    m = jnp.max(logits, axis=-1, keepdims=True)
    e = jnp.exp(logits - m)
    denom = jnp.sum(e, axis=-1, keepdims=True)
    r = pl.reciprocal(denom, approx=True)       # EUP vrcp, off the VPU
    r = r * (2.0 - denom * r)                   # one Newton step -> ~f32 exact
    out_ref[...] = e * r


def _round_up(x, m):
    return (x + m - 1) // m * m


def _choose_block_b(batch):
    """Sublane-full batch tile; >=2 grid steps once B_pad>=16 (v7x 2 TCs)."""
    b8 = _round_up(batch, 8)
    if b8 >= 16:
        return min(256, _round_up(pl.cdiv(b8, 2), 8))   # cap fills MXU M dim
    return b8


def prepare_params(params):
    """One-time weight padding + bf16 cast, hoisted out of the forward path."""
    w_ih = jnp.pad(params["w_ih"], ((0, IN_PAD - IN_SIZE), (0, 0)))
    w_comb_g = jnp.pad(params["w_comb_g"], ((0, G_PAD - N_LETTERS), (0, 0)))
    w_out = jnp.pad(params["w_out"], ((0, 0), (0, OUT_PAD - N_LETTERS)))
    b_out = jnp.pad(params["b_out"], ((0, 0), (0, OUT_PAD - N_LETTERS)),
                    constant_values=NEG_BIG)
    return dict(
        w_ih=w_ih.astype(jnp.bfloat16),
        w_hh=params["w_hh"].astype(jnp.bfloat16),
        b_lstm=params["b_lstm"].astype(jnp.float32),
        w_comb_h=params["w_comb_h"].astype(jnp.bfloat16),
        w_comb_g=w_comb_g.astype(jnp.bfloat16),
        b_comb=params["b_comb"].astype(jnp.float32),
        w_out=w_out.astype(jnp.bfloat16),
        b_out=b_out.astype(jnp.float32),
    )


def mary_lstm_forward(word_state, guessed_letters, prep, block_b=None):
    """word_state: (B, T, 27) batch_first; guessed_letters: (B, 26) -> (B, 26)."""
    B, T, in_dim = word_state.shape
    H = prep["w_hh"].shape[0]

    if block_b is None:
        block_b = _choose_block_b(B)
    block_b = _round_up(block_b, 8)
    B_pad = _round_up(B, block_b)
    n_blocks = B_pad // block_b

    # ---- pad activations: time-major input, lane-friendly feature dims ----
    # (At production batch sizes, fold this transpose into the data producer.)
    x_tm = jnp.transpose(word_state, (1, 0, 2)).astype(jnp.float32)   # (T,B,27)
    x_tm = jnp.pad(x_tm, ((0, 0), (0, B_pad - B), (0, IN_PAD - in_dim)))
    guessed = jnp.pad(guessed_letters.astype(jnp.float32),
                      ((0, B_pad - B), (0, G_PAD - N_LETTERS)))

    def full(a):  # whole (small) array resident every grid step
        nd = a.ndim
        return pl.BlockSpec(a.shape, lambda i, _nd=nd: (0,) * _nd)

    in_specs = [
        pl.BlockSpec((T, block_b, IN_PAD), lambda i: (0, i, 0)),
        pl.BlockSpec((block_b, G_PAD), lambda i: (i, 0)),
        full(prep["w_ih"]), full(prep["w_hh"]), full(prep["b_lstm"]),
        full(prep["w_comb_h"]), full(prep["w_comb_g"]), full(prep["b_comb"]),
        full(prep["w_out"]), full(prep["b_out"]),
    ]
    out_specs = pl.BlockSpec((block_b, OUT_PAD), lambda i: (i, 0))

    args = (x_tm, guessed,
            prep["w_ih"], prep["w_hh"], prep["b_lstm"],
            prep["w_comb_h"], prep["w_comb_g"], prep["b_comb"],
            prep["w_out"], prep["b_out"])

    flops = (2 * T * B_pad * IN_PAD * 4 * H          # fused input projection
             + 2 * T * B_pad * H * 4 * H             # recurrent matmuls
             + 2 * B_pad * (H * H + G_PAD * H + H * OUT_PAD))
    transcendentals = 5 * T * B_pad * H + B_pad * (OUT_PAD + 1)
    bytes_accessed = (sum(int(a.size) * a.dtype.itemsize for a in args)
                      + B_pad * OUT_PAD * 4)

    probs_pad = pl.pallas_call(
        mary_lstm_kernel,
        out_shape=jax.ShapeDtypeStruct((B_pad, OUT_PAD), jnp.float32),
        grid=(n_blocks,),
        in_specs=in_specs,
        out_specs=out_specs,
        compiler_params=pltpu.CompilerParams(
            dimension_semantics=("parallel",)),      # batch grid -> 2 TCs on v7x
        cost_estimate=pl.CostEstimate(flops=flops,
                                      transcendentals=transcendentals,
                                      bytes_accessed=bytes_accessed),
    )(*args)

    return probs_pad[:B, :N_LETTERS]


def init_params(key, hidden_dim=128, input_size=IN_SIZE, n_letters=N_LETTERS):
    """Deterministic synthetic parameters (shapes match nn.LSTM / nn.Linear)."""
    ks = jax.random.split(key, 8)
    H = hidden_dim
    u = lambda k, shape, s: jax.random.uniform(k, shape, jnp.float32, -s, s)
    s_lstm = 1.0 / jnp.sqrt(H)
    # PyTorch weight_ih_l0: (4H, 27), weight_hh_l0: (4H, H); pre-transposed here.
    w_ih = u(ks[0], (input_size, 4 * H), s_lstm)
    w_hh = u(ks[1], (H, 4 * H), s_lstm)
    b_lstm = (u(ks[2], (1, 4 * H), s_lstm)
              + u(ks[3], (1, 4 * H), s_lstm))              # b_ih + b_hh
    # combine: Linear(H + 26, H) -> split weight into h-part and guessed-part
    s_c = 1.0 / jnp.sqrt(H + n_letters)
    w_comb = u(ks[4], (H + n_letters, H), s_c)
    w_comb_h = w_comb[:H, :]
    w_comb_g = w_comb[H:, :]
    b_comb = u(ks[5], (1, H), s_c)
    # output: Linear(H, 26)
    s_o = 1.0 / jnp.sqrt(H)
    w_out = u(ks[6], (H, n_letters), s_o)
    b_out = u(ks[7], (1, n_letters), s_o)
    return dict(w_ih=w_ih, w_hh=w_hh, b_lstm=b_lstm,
                w_comb_h=w_comb_h, w_comb_g=w_comb_g, b_comb=b_comb,
                w_out=w_out, b_out=b_out)


def reference_forward(word_state, guessed, p):
    """Pure-JAX f32 reference (same math, unpadded) for correctness checking."""
    B, T, _ = word_state.shape
    H = p["w_hh"].shape[0]
    h = jnp.zeros((B, H), jnp.float32)
    c = jnp.zeros((B, H), jnp.float32)
    for t in range(T):
        gates = word_state[:, t, :] @ p["w_ih"] + h @ p["w_hh"] + p["b_lstm"]
        i_g = jax.nn.sigmoid(gates[:, :H])
        f_g = jax.nn.sigmoid(gates[:, H:2 * H])
        g_g = jnp.tanh(gates[:, 2 * H:3 * H])
        o_g = jax.nn.sigmoid(gates[:, 3 * H:])
        c = f_g * c + i_g * g_g
        h = o_g * jnp.tanh(c)
    hidden = jax.nn.relu(h @ p["w_comb_h"] + guessed @ p["w_comb_g"] + p["b_comb"])
    return jax.nn.softmax(hidden @ p["w_out"] + p["b_out"], axis=-1)


if __name__ == "__main__":
    B, T, H = 2, 8, 128
    key = jax.random.PRNGKey(0)
    k_ws, k_gl, k_params = jax.random.split(key, 3)

    # word_state: character encodings (B, T, 27); guessed: (B, 26)
    word_state = jax.random.uniform(k_ws, (B, T, 27), jnp.float32)
    guessed_letters = (jax.random.uniform(k_gl, (B, 26), jnp.float32) > 0.5
                       ).astype(jnp.float32)

    params = init_params(k_params, hidden_dim=H)
    prep = prepare_params(params)            # one-time pad + bf16 cast

    fwd = jax.jit(mary_lstm_forward)
    probs = jax.block_until_ready(fwd(word_state, guessed_letters, prep))

    ref = reference_forward(word_state, guessed_letters, params)
    assert probs.shape == (B, 26)
    # Softmax rows sum to 1 (Newton-refined reciprocal keeps this ~f32 exact).
    assert jnp.allclose(jnp.sum(probs, axis=-1), 1.0, atol=1e-4)
    # Tolerance relaxed vs the f32 reference because MXU operands are bf16.
    assert jnp.allclose(probs, ref, atol=5e-3, rtol=5e-2)

    print("KERNEL_OK")
</pallas_src>

<mosaic_0001>
module attributes {stable_mosaic.version = 11 : i64} {
  func.func @mary_lstm_kernel(%arg0: i32, %arg1: memref<8x8x32xf32, #tpu.memory_space<vmem>>, %arg2: memref<8x32xf32, #tpu.memory_space<vmem>>, %arg3: memref<32x512xbf16, #tpu.memory_space<vmem>>, %arg4: memref<128x512xbf16, #tpu.memory_space<vmem>>, %arg5: memref<1x512xf32, #tpu.memory_space<vmem>>, %arg6: memref<128x128xbf16, #tpu.memory_space<vmem>>, %arg7: memref<32x128xbf16, #tpu.memory_space<vmem>>, %arg8: memref<1x128xf32, #tpu.memory_space<vmem>>, %arg9: memref<128x128xbf16, #tpu.memory_space<vmem>>, %arg10: memref<1x128xf32, #tpu.memory_space<vmem>>, %arg11: memref<8x128xf32, #tpu.memory_space<vmem>>) attributes {dimension_semantics = [#tpu.dimension_semantics<parallel>], iteration_bounds = array<i64: 1>, scalar_prefetch = 0 : i64, scratch_operands = 0 : i64, tpu.core_type = #tpu.core_type<tc>, window_params = [{transform_indices = @transform_0, window_bounds = array<i64: 8, 8, 32>}, {transform_indices = @transform_1, window_bounds = array<i64: 8, 32>}, {pipeline_mode = #tpu.pipeline_mode<synchronous>, transform_indices = @transform_2, window_bounds = array<i64: 32, 512>}, {pipeline_mode = #tpu.pipeline_mode<synchronous>, transform_indices = @transform_3, window_bounds = array<i64: 128, 512>}, {pipeline_mode = #tpu.pipeline_mode<synchronous>, transform_indices = @transform_4, window_bounds = array<i64: 1, 512>}, {pipeline_mode = #tpu.pipeline_mode<synchronous>, transform_indices = @transform_5, window_bounds = array<i64: 128, 128>}, {pipeline_mode = #tpu.pipeline_mode<synchronous>, transform_indices = @transform_6, window_bounds = array<i64: 32, 128>}, {pipeline_mode = #tpu.pipeline_mode<synchronous>, transform_indices = @transform_7, window_bounds = array<i64: 1, 128>}, {pipeline_mode = #tpu.pipeline_mode<synchronous>, transform_indices = @transform_8, window_bounds = array<i64: 128, 128>}, {pipeline_mode = #tpu.pipeline_mode<synchronous>, transform_indices = @transform_9, window_bounds = array<i64: 1, 128>}, {transform_indices = @transform_10, window_bounds = array<i64: 8, 128>}]} {
    %c0 = arith.constant 0 : index
    %c0_0 = arith.constant 0 : index
    %0 = vector.load %arg4[%c0, %c0_0] : memref<128x512xbf16, #tpu.memory_space<vmem>>, vector<128x512xbf16>
    %c0_1 = arith.constant 0 : index
    %c0_2 = arith.constant 0 : index
    %c0_3 = arith.constant 0 : index
    %1 = vector.load %arg1[%c0_1, %c0_2, %c0_3] : memref<8x8x32xf32, #tpu.memory_space<vmem>>, vector<8x8x32xf32>
    %2 = vector.shape_cast %1 : vector<8x8x32xf32> to vector<64x32xf32>
    %3 = arith.truncf %2 : vector<64x32xf32> to vector<64x32xbf16>
    %c0_4 = arith.constant 0 : index
    %c0_5 = arith.constant 0 : index
    %4 = vector.load %arg3[%c0_4, %c0_5] : memref<32x512xbf16, #tpu.memory_space<vmem>>, vector<32x512xbf16>
    %cst = arith.constant dense<0.000000e+00> : vector<64x512xf32>
    %5 = tpu.matmul %3, %4, %cst {dimension_numbers = #tpu.dot_dimension_numbers<[1], [0], [0], [1], [0, 0, 1, 1], [], []>} : vector<64x32xbf16>, vector<32x512xbf16>, vector<64x512xf32> -> vector<64x512xf32>
    %c0_6 = arith.constant 0 : index
    %c0_7 = arith.constant 0 : index
    %6 = vector.load %arg5[%c0_6, %c0_7] : memref<1x512xf32, #tpu.memory_space<vmem>>, vector<1x512xf32>
    %7 = vector.shape_cast %6 : vector<1x512xf32> to vector<1x512xf32>
    %8 = vector.broadcast %7 : vector<1x512xf32> to vector<64x512xf32>
    %9 = arith.addf %5, %8 : vector<64x512xf32>
    %cst_8 = arith.constant 0.000000e+00 : f32
    %10 = vector.broadcast %cst_8 : f32 to vector<8x128xf32>
    %cst_9 = arith.constant 0.000000e+00 : f32
    %11 = vector.broadcast %cst_9 : f32 to vector<8x128xf32>
    %12 = vector.extract_strided_slice %9 {offsets = [0, 0], sizes = [8, 512], strides = [1, 1]} : vector<64x512xf32> to vector<8x512xf32>
    %13 = arith.truncf %10 : vector<8x128xf32> to vector<8x128xbf16>
    %cst_10 = arith.constant dense<0.000000e+00> : vector<8x512xf32>
    %14 = tpu.matmul %13, %0, %cst_10 {dimension_numbers = #tpu.dot_dimension_numbers<[1], [0], [0], [1], [0, 0, 1, 1], [], []>} : vector<8x128xbf16>, vector<128x512xbf16>, vector<8x512xf32> -> vector<8x512xf32>
    %15 = arith.addf %12, %14 : vector<8x512xf32>
    %16 = vector.extract_strided_slice %15 {offsets = [0, 0], sizes = [8, 128], strides = [1, 1]} : vector<8x512xf32> to vector<8x128xf32>
    %17 = arith.negf %16 : vector<8x128xf32>
    %18 = math.exp %17 : vector<8x128xf32>
    %cst_11 = arith.constant 1.000000e+00 : f32
    %19 = vector.broadcast %cst_11 : f32 to vector<8x128xf32>
    %20 = arith.addf %19, %18 : vector<8x128xf32>
    %21 = arith.divf %19, %20 : vector<8x128xf32>
    %22 = vector.extract_strided_slice %15 {offsets = [0, 128], sizes = [8, 128], strides = [1, 1]} : vector<8x512xf32> to vector<8x128xf32>
    %23 = arith.negf %22 : vector<8x128xf32>
    %24 = math.exp %23 : vector<8x128xf32>
    %cst_12 = arith.constant 1.000000e+00 : f32
    %25 = vector.broadcast %cst_12 : f32 to vector<8x128xf32>
    %26 = arith.addf %25, %24 : vector<8x128xf32>
    %27 = arith.divf %25, %26 : vector<8x128xf32>
    %28 = vector.extract_strided_slice %15 {offsets = [0, 256], sizes = [8, 128], strides = [1, 1]} : vector<8x512xf32> to vector<8x128xf32>
    %29 = math.tanh %28 : vector<8x128xf32>
    %30 = vector.extract_strided_slice %15 {offsets = [0, 384], sizes = [8, 128], strides = [1, 1]} : vector<8x512xf32> to vector<8x128xf32>
    %31 = arith.negf %30 : vector<8x128xf32>
    %32 = math.exp %31 : vector<8x128xf32>
    %cst_13 = arith.constant 1.000000e+00 : f32
    %33 = vector.broadcast %cst_13 : f32 to vector<8x128xf32>
    %34 = arith.addf %33, %32 : vector<8x128xf32>
    %35 = arith.divf %33, %34 : vector<8x128xf32>
    %36 = arith.mulf %27, %11 : vector<8x128xf32>
    %37 = arith.mulf %21, %29 : vector<8x128xf32>
    %38 = arith.addf %36, %37 : vector<8x128xf32>
    %39 = math.tanh %38 : vector<8x128xf32>
    %40 = arith.mulf %35, %39 : vector<8x128xf32>
    %41 = vector.extract_strided_slice %9 {offsets = [8, 0], sizes = [8, 512], strides = [1, 1]} : vector<64x512xf32> to vector<8x512xf32>
    %42 = arith.truncf %40 : vector<8x128xf32> to vector<8x128xbf16>
    %cst_14 = arith.constant dense<0.000000e+00> : vector<8x512xf32>
    %43 = tpu.matmul %42, %0, %cst_14 {dimension_numbers = #tpu.dot_dimension_numbers<[1], [0], [0], [1], [0, 0, 1, 1], [], []>} : vector<8x128xbf16>, vector<128x512xbf16>, vector<8x512xf32> -> vector<8x512xf32>
    %44 = arith.addf %41, %43 : vector<8x512xf32>
    %45 = vector.extract_strided_slice %44 {offsets = [0, 0], sizes = [8, 128], strides = [1, 1]} : vector<8x512xf32> to vector<8x128xf32>
    %46 = arith.negf %45 : vector<8x128xf32>
    %47 = math.exp %46 : vector<8x128xf32>
    %cst_15 = arith.constant 1.000000e+00 : f32
    %48 = vector.broadcast %cst_15 : f32 to vector<8x128xf32>
    %49 = arith.addf %48, %47 : vector<8x128xf32>
    %50 = arith.divf %48, %49 : vector<8x128xf32>
    %51 = vector.extract_strided_slice %44 {offsets = [0, 128], sizes = [8, 128], strides = [1, 1]} : vector<8x512xf32> to vector<8x128xf32>
    %52 = arith.negf %51 : vector<8x128xf32>
    %53 = math.exp %52 : vector<8x128xf32>
    %cst_16 = arith.constant 1.000000e+00 : f32
    %54 = vector.broadcast %cst_16 : f32 to vector<8x128xf32>
    %55 = arith.addf %54, %53 : vector<8x128xf32>
    %56 = arith.divf %54, %55 : vector<8x128xf32>
    %57 = vector.extract_strided_slice %44 {offsets = [0, 256], sizes = [8, 128], strides = [1, 1]} : vector<8x512xf32> to vector<8x128xf32>
    %58 = math.tanh %57 : vector<8x128xf32>
    %59 = vector.extract_strided_slice %44 {offsets = [0, 384], sizes = [8, 128], strides = [1, 1]} : vector<8x512xf32> to vector<8x128xf32>
    %60 = arith.negf %59 : vector<8x128xf32>
    %61 = math.exp %60 : vector<8x128xf32>
    %cst_17 = arith.constant 1.000000e+00 : f32
    %62 = vector.broadcast %cst_17 : f32 to vector<8x128xf32>
    %63 = arith.addf %62, %61 : vector<8x128xf32>
    %64 = arith.divf %62, %63 : vector<8x128xf32>
    %65 = arith.mulf %56, %38 : vector<8x128xf32>
    %66 = arith.mulf %50, %58 : vector<8x128xf32>
    %67 = arith.addf %65, %66 : vector<8x128xf32>
    %68 = math.tanh %67 : vector<8x128xf32>
    %69 = arith.mulf %64, %68 : vector<8x128xf32>
    %70 = vector.extract_strided_slice %9 {offsets = [16, 0], sizes = [8, 512], strides = [1, 1]} : vector<64x512xf32> to vector<8x512xf32>
    %71 = arith.truncf %69 : vector<8x128xf32> to vector<8x128xbf16>
    %cst_18 = arith.constant dense<0.000000e+00> : vector<8x512xf32>
    %72 = tpu.matmul %71, %0, %cst_18 {dimension_numbers = #tpu.dot_dimension_numbers<[1], [0], [0], [1], [0, 0, 1, 1], [], []>} : vector<8x128xbf16>, vector<128x512xbf16>, vector<8x512xf32> -> vector<8x512xf32>
    %73 = arith.addf %70, %72 : vector<8x512xf32>
    %74 = vector.extract_strided_slice %73 {offsets = [0, 0], sizes = [8, 128], strides = [1, 1]} : vector<8x512xf32> to vector<8x128xf32>
    %75 = arith.negf %74 : vector<8x128xf32>
    %76 = math.exp %75 : vector<8x128xf32>
    %cst_19 = arith.constant 1.000000e+00 : f32
    %77 = vector.broadcast %cst_19 : f32 to vector<8x128xf32>
    %78 = arith.addf %77, %76 : vector<8x128xf32>
    %79 = arith.divf %77, %78 : vector<8x128xf32>
    %80 = vector.extract_strided_slice %73 {offsets = [0, 128], sizes = [8, 128], strides = [1, 1]} : vector<8x512xf32> to vector<8x128xf32>
    %81 = arith.negf %80 : vector<8x128xf32>
    %82 = math.exp %81 : vector<8x128xf32>
    %cst_20 = arith.constant 1.000000e+00 : f32
    %83 = vector.broadcast %cst_20 : f32 to vector<8x128xf32>
    %84 = arith.addf %83, %82 : vector<8x128xf32>
    %85 = arith.divf %83, %84 : vector<8x128xf32>
    %86 = vector.extract_strided_slice %73 {offsets = [0, 256], sizes = [8, 128], strides = [1, 1]} : vector<8x512xf32> to vector<8x128xf32>
    %87 = math.tanh %86 : vector<8x128xf32>
    %88 = vector.extract_strided_slice %73 {offsets = [0, 384], sizes = [8, 128], strides = [1, 1]} : vector<8x512xf32> to vector<8x128xf32>
    %89 = arith.negf %88 : vector<8x128xf32>
    %90 = math.exp %89 : vector<8x128xf32>
    %cst_21 = arith.constant 1.000000e+00 : f32
    %91 = vector.broadcast %cst_21 : f32 to vector<8x128xf32>
    %92 = arith.addf %91, %90 : vector<8x128xf32>
    %93 = arith.divf %91, %92 : vector<8x128xf32>
    %94 = arith.mulf %85, %67 : vector<8x128xf32>
    %95 = arith.mulf %79, %87 : vector<8x128xf32>
    %96 = arith.addf %94, %95 : vector<8x128xf32>
    %97 = math.tanh %96 : vector<8x128xf32>
    %98 = arith.mulf %93, %97 : vector<8x128xf32>
    %99 = vector.extract_strided_slice %9 {offsets = [24, 0], sizes = [8, 512], strides = [1, 1]} : vector<64x512xf32> to vector<8x512xf32>
    %100 = arith.truncf %98 : vector<8x128xf32> to vector<8x128xbf16>
    %cst_22 = arith.constant dense<0.000000e+00> : vector<8x512xf32>
    %101 = tpu.matmul %100, %0, %cst_22 {dimension_numbers = #tpu.dot_dimension_numbers<[1], [0], [0], [1], [0, 0, 1, 1], [], []>} : vector<8x128xbf16>, vector<128x512xbf16>, vector<8x512xf32> -> vector<8x512xf32>
    %102 = arith.addf %99, %101 : vector<8x512xf32>
    %103 = vector.extract_strided_slice %102 {offsets = [0, 0], sizes = [8, 128], strides = [1, 1]} : vector<8x512xf32> to vector<8x128xf32>
    %104 = arith.negf %103 : vector<8x128xf32>
    %105 = math.exp %104 : vector<8x128xf32>
    %cst_23 = arith.constant 1.000000e+00 : f32
    %106 = vector.broadcast %cst_23 : f32 to vector<8x128xf32>
    %107 = arith.addf %106, %105 : vector<8x128xf32>
    %108 = arith.divf %106, %107 : vector<8x128xf32>
    %109 = vector.extract_strided_slice %102 {offsets = [0, 128], sizes = [8, 128], strides = [1, 1]} : vector<8x512xf32> to vector<8x128xf32>
    %110 = arith.negf %109 : vector<8x128xf32>
    %111 = math.exp %110 : vector<8x128xf32>
    %cst_24 = arith.constant 1.000000e+00 : f32
    %112 = vector.broadcast %cst_24 : f32 to vector<8x128xf32>
    %113 = arith.addf %112, %111 : vector<8x128xf32>
    %114 = arith.divf %112, %113 : vector<8x128xf32>
    %115 = vector.extract_strided_slice %102 {offsets = [0, 256], sizes = [8, 128], strides = [1, 1]} : vector<8x512xf32> to vector<8x128xf32>
    %116 = math.tanh %115 : vector<8x128xf32>
    %117 = vector.extract_strided_slice %102 {offsets = [0, 384], sizes = [8, 128], strides = [1, 1]} : vector<8x512xf32> to vector<8x128xf32>
    %118 = arith.negf %117 : vector<8x128xf32>
    %119 = math.exp %118 : vector<8x128xf32>
    %cst_25 = arith.constant 1.000000e+00 : f32
    %120 = vector.broadcast %cst_25 : f32 to vector<8x128xf32>
    %121 = arith.addf %120, %119 : vector<8x128xf32>
    %122 = arith.divf %120, %121 : vector<8x128xf32>
    %123 = arith.mulf %114, %96 : vector<8x128xf32>
    %124 = arith.mulf %108, %116 : vector<8x128xf32>
    %125 = arith.addf %123, %124 : vector<8x128xf32>
    %126 = math.tanh %125 : vector<8x128xf32>
    %127 = arith.mulf %122, %126 : vector<8x128xf32>
    %128 = vector.extract_strided_slice %9 {offsets = [32, 0], sizes = [8, 512], strides = [1, 1]} : vector<64x512xf32> to vector<8x512xf32>
    %129 = arith.truncf %127 : vector<8x128xf32> to vector<8x128xbf16>
    %cst_26 = arith.constant dense<0.000000e+00> : vector<8x512xf32>
    %130 = tpu.matmul %129, %0, %cst_26 {dimension_numbers = #tpu.dot_dimension_numbers<[1], [0], [0], [1], [0, 0, 1, 1], [], []>} : vector<8x128xbf16>, vector<128x512xbf16>, vector<8x512xf32> -> vector<8x512xf32>
    %131 = arith.addf %128, %130 : vector<8x512xf32>
    %132 = vector.extract_strided_slice %131 {offsets = [0, 0], sizes = [8, 128], strides = [1, 1]} : vector<8x512xf32> to vector<8x128xf32>
    %133 = arith.negf %132 : vector<8x128xf32>
    %134 = math.exp %133 : vector<8x128xf32>
    %cst_27 = arith.constant 1.000000e+00 : f32
    %135 = vector.broadcast %cst_27 : f32 to vector<8x128xf32>
    %136 = arith.addf %135, %134 : vector<8x128xf32>
    %137 = arith.divf %135, %136 : vector<8x128xf32>
    %138 = vector.extract_strided_slice %131 {offsets = [0, 128], sizes = [8, 128], strides = [1, 1]} : vector<8x512xf32> to vector<8x128xf32>
    %139 = arith.negf %138 : vector<8x128xf32>
    %140 = math.exp %139 : vector<8x128xf32>
    %cst_28 = arith.constant 1.000000e+00 : f32
    %141 = vector.broadcast %cst_28 : f32 to vector<8x128xf32>
    %142 = arith.addf %141, %140 : vector<8x128xf32>
    %143 = arith.divf %141, %142 : vector<8x128xf32>
    %144 = vector.extract_strided_slice %131 {offsets = [0, 256], sizes = [8, 128], strides = [1, 1]} : vector<8x512xf32> to vector<8x128xf32>
    %145 = math.tanh %144 : vector<8x128xf32>
    %146 = vector.extract_strided_slice %131 {offsets = [0, 384], sizes = [8, 128], strides = [1, 1]} : vector<8x512xf32> to vector<8x128xf32>
    %147 = arith.negf %146 : vector<8x128xf32>
    %148 = math.exp %147 : vector<8x128xf32>
    %cst_29 = arith.constant 1.000000e+00 : f32
    %149 = vector.broadcast %cst_29 : f32 to vector<8x128xf32>
    %150 = arith.addf %149, %148 : vector<8x128xf32>
    %151 = arith.divf %149, %150 : vector<8x128xf32>
    %152 = arith.mulf %143, %125 : vector<8x128xf32>
    %153 = arith.mulf %137, %145 : vector<8x128xf32>
    %154 = arith.addf %152, %153 : vector<8x128xf32>
    %155 = math.tanh %154 : vector<8x128xf32>
    %156 = arith.mulf %151, %155 : vector<8x128xf32>
    %157 = vector.extract_strided_slice %9 {offsets = [40, 0], sizes = [8, 512], strides = [1, 1]} : vector<64x512xf32> to vector<8x512xf32>
    %158 = arith.truncf %156 : vector<8x128xf32> to vector<8x128xbf16>
    %cst_30 = arith.constant dense<0.000000e+00> : vector<8x512xf32>
    %159 = tpu.matmul %158, %0, %cst_30 {dimension_numbers = #tpu.dot_dimension_numbers<[1], [0], [0], [1], [0, 0, 1, 1], [], []>} : vector<8x128xbf16>, vector<128x512xbf16>, vector<8x512xf32> -> vector<8x512xf32>
    %160 = arith.addf %157, %159 : vector<8x512xf32>
    %161 = vector.extract_strided_slice %160 {offsets = [0, 0], sizes = [8, 128], strides = [1, 1]} : vector<8x512xf32> to vector<8x128xf32>
    %162 = arith.negf %161 : vector<8x128xf32>
    %163 = math.exp %162 : vector<8x128xf32>
    %cst_31 = arith.constant 1.000000e+00 : f32
    %164 = vector.broadcast %cst_31 : f32 to vector<8x128xf32>
    %165 = arith.addf %164, %163 : vector<8x128xf32>
    %166 = arith.divf %164, %165 : vector<8x128xf32>
    %167 = vector.extract_strided_slice %160 {offsets = [0, 128], sizes = [8, 128], strides = [1, 1]} : vector<8x512xf32> to vector<8x128xf32>
    %168 = arith.negf %167 : vector<8x128xf32>
    %169 = math.exp %168 : vector<8x128xf32>
    %cst_32 = arith.constant 1.000000e+00 : f32
    %170 = vector.broadcast %cst_32 : f32 to vector<8x128xf32>
    %171 = arith.addf %170, %169 : vector<8x128xf32>
    %172 = arith.divf %170, %171 : vector<8x128xf32>
    %173 = vector.extract_strided_slice %160 {offsets = [0, 256], sizes = [8, 128], strides = [1, 1]} : vector<8x512xf32> to vector<8x128xf32>
    %174 = math.tanh %173 : vector<8x128xf32>
    %175 = vector.extract_strided_slice %160 {offsets = [0, 384], sizes = [8, 128], strides = [1, 1]} : vector<8x512xf32> to vector<8x128xf32>
    %176 = arith.negf %175 : vector<8x128xf32>
    %177 = math.exp %176 : vector<8x128xf32>
    %cst_33 = arith.constant 1.000000e+00 : f32
    %178 = vector.broadcast %cst_33 : f32 to vector<8x128xf32>
    %179 = arith.addf %178, %177 : vector<8x128xf32>
    %180 = arith.divf %178, %179 : vector<8x128xf32>
    %181 = arith.mulf %172, %154 : vector<8x128xf32>
    %182 = arith.mulf %166, %174 : vector<8x128xf32>
    %183 = arith.addf %181, %182 : vector<8x128xf32>
    %184 = math.tanh %183 : vector<8x128xf32>
    %185 = arith.mulf %180, %184 : vector<8x128xf32>
    %186 = vector.extract_strided_slice %9 {offsets = [48, 0], sizes = [8, 512], strides = [1, 1]} : vector<64x512xf32> to vector<8x512xf32>
    %187 = arith.truncf %185 : vector<8x128xf32> to vector<8x128xbf16>
    %cst_34 = arith.constant dense<0.000000e+00> : vector<8x512xf32>
    %188 = tpu.matmul %187, %0, %cst_34 {dimension_numbers = #tpu.dot_dimension_numbers<[1], [0], [0], [1], [0, 0, 1, 1], [], []>} : vector<8x128xbf16>, vector<128x512xbf16>, vector<8x512xf32> -> vector<8x512xf32>
    %189 = arith.addf %186, %188 : vector<8x512xf32>
    %190 = vector.extract_strided_slice %189 {offsets = [0, 0], sizes = [8, 128], strides = [1, 1]} : vector<8x512xf32> to vector<8x128xf32>
    %191 = arith.negf %190 : vector<8x128xf32>
    %192 = math.exp %191 : vector<8x128xf32>
    %cst_35 = arith.constant 1.000000e+00 : f32
    %193 = vector.broadcast %cst_35 : f32 to vector<8x128xf32>
    %194 = arith.addf %193, %192 : vector<8x128xf32>
    %195 = arith.divf %193, %194 : vector<8x128xf32>
    %196 = vector.extract_strided_slice %189 {offsets = [0, 128], sizes = [8, 128], strides = [1, 1]} : vector<8x512xf32> to vector<8x128xf32>
    %197 = arith.negf %196 : vector<8x128xf32>
    %198 = math.exp %197 : vector<8x128xf32>
    %cst_36 = arith.constant 1.000000e+00 : f32
    %199 = vector.broadcast %cst_36 : f32 to vector<8x128xf32>
    %200 = arith.addf %199, %198 : vector<8x128xf32>
    %201 = arith.divf %199, %200 : vector<8x128xf32>
    %202 = vector.extract_strided_slice %189 {offsets = [0, 256], sizes = [8, 128], strides = [1, 1]} : vector<8x512xf32> to vector<8x128xf32>
    %203 = math.tanh %202 : vector<8x128xf32>
    %204 = vector.extract_strided_slice %189 {offsets = [0, 384], sizes = [8, 128], strides = [1, 1]} : vector<8x512xf32> to vector<8x128xf32>
    %205 = arith.negf %204 : vector<8x128xf32>
    %206 = math.exp %205 : vector<8x128xf32>
    %cst_37 = arith.constant 1.000000e+00 : f32
    %207 = vector.broadcast %cst_37 : f32 to vector<8x128xf32>
    %208 = arith.addf %207, %206 : vector<8x128xf32>
    %209 = arith.divf %207, %208 : vector<8x128xf32>
    %210 = arith.mulf %201, %183 : vector<8x128xf32>
    %211 = arith.mulf %195, %203 : vector<8x128xf32>
    %212 = arith.addf %210, %211 : vector<8x128xf32>
    %213 = math.tanh %212 : vector<8x128xf32>
    %214 = arith.mulf %209, %213 : vector<8x128xf32>
    %215 = vector.extract_strided_slice %9 {offsets = [56, 0], sizes = [8, 512], strides = [1, 1]} : vector<64x512xf32> to vector<8x512xf32>
    %216 = arith.truncf %214 : vector<8x128xf32> to vector<8x128xbf16>
    %cst_38 = arith.constant dense<0.000000e+00> : vector<8x512xf32>
    %217 = tpu.matmul %216, %0, %cst_38 {dimension_numbers = #tpu.dot_dimension_numbers<[1], [0], [0], [1], [0, 0, 1, 1], [], []>} : vector<8x128xbf16>, vector<128x512xbf16>, vector<8x512xf32> -> vector<8x512xf32>
    %218 = arith.addf %215, %217 : vector<8x512xf32>
    %219 = vector.extract_strided_slice %218 {offsets = [0, 0], sizes = [8, 128], strides = [1, 1]} : vector<8x512xf32> to vector<8x128xf32>
    %220 = arith.negf %219 : vector<8x128xf32>
    %221 = math.exp %220 : vector<8x128xf32>
    %cst_39 = arith.constant 1.000000e+00 : f32
    %222 = vector.broadcast %cst_39 : f32 to vector<8x128xf32>
    %223 = arith.addf %222, %221 : vector<8x128xf32>
    %224 = arith.divf %222, %223 : vector<8x128xf32>
    %225 = vector.extract_strided_slice %218 {offsets = [0, 128], sizes = [8, 128], strides = [1, 1]} : vector<8x512xf32> to vector<8x128xf32>
    %226 = arith.negf %225 : vector<8x128xf32>
    %227 = math.exp %226 : vector<8x128xf32>
    %cst_40 = arith.constant 1.000000e+00 : f32
    %228 = vector.broadcast %cst_40 : f32 to vector<8x128xf32>
    %229 = arith.addf %228, %227 : vector<8x128xf32>
    %230 = arith.divf %228, %229 : vector<8x128xf32>
    %231 = vector.extract_strided_slice %218 {offsets = [0, 256], sizes = [8, 128], strides = [1, 1]} : vector<8x512xf32> to vector<8x128xf32>
    %232 = math.tanh %231 : vector<8x128xf32>
    %233 = vector.extract_strided_slice %218 {offsets = [0, 384], sizes = [8, 128], strides = [1, 1]} : vector<8x512xf32> to vector<8x128xf32>
    %234 = arith.negf %233 : vector<8x128xf32>
    %235 = math.exp %234 : vector<8x128xf32>
    %cst_41 = arith.constant 1.000000e+00 : f32
    %236 = vector.broadcast %cst_41 : f32 to vector<8x128xf32>
    %237 = arith.addf %236, %235 : vector<8x128xf32>
    %238 = arith.divf %236, %237 : vector<8x128xf32>
    %239 = arith.mulf %230, %212 : vector<8x128xf32>
    %240 = arith.mulf %224, %232 : vector<8x128xf32>
    %241 = arith.addf %239, %240 : vector<8x128xf32>
    %242 = math.tanh %241 : vector<8x128xf32>
    %243 = arith.mulf %238, %242 : vector<8x128xf32>
    %244 = arith.truncf %243 : vector<8x128xf32> to vector<8x128xbf16>
    %c0_42 = arith.constant 0 : index
    %c0_43 = arith.constant 0 : index
    %245 = vector.load %arg6[%c0_42, %c0_43] : memref<128x128xbf16, #tpu.memory_space<vmem>>, vector<128x128xbf16>
    %cst_44 = arith.constant dense<0.000000e+00> : vector<8x128xf32>
    %246 = tpu.matmul %244, %245, %cst_44 {dimension_numbers = #tpu.dot_dimension_numbers<[1], [0], [0], [1], [0, 0, 1, 1], [], []>} : vector<8x128xbf16>, vector<128x128xbf16>, vector<8x128xf32> -> vector<8x128xf32>
    %c0_45 = arith.constant 0 : index
    %c0_46 = arith.constant 0 : index
    %247 = vector.load %arg2[%c0_45, %c0_46] : memref<8x32xf32, #tpu.memory_space<vmem>>, vector<8x32xf32>
    %248 = arith.truncf %247 : vector<8x32xf32> to vector<8x32xbf16>
    %c0_47 = arith.constant 0 : index
    %c0_48 = arith.constant 0 : index
    %249 = vector.load %arg7[%c0_47, %c0_48] : memref<32x128xbf16, #tpu.memory_space<vmem>>, vector<32x128xbf16>
    %cst_49 = arith.constant dense<0.000000e+00> : vector<8x128xf32>
    %250 = tpu.matmul %248, %249, %cst_49 {dimension_numbers = #tpu.dot_dimension_numbers<[1], [0], [0], [1], [0, 0, 1, 1], [], []>} : vector<8x32xbf16>, vector<32x128xbf16>, vector<8x128xf32> -> vector<8x128xf32>
    %251 = arith.addf %246, %250 : vector<8x128xf32>
    %c0_50 = arith.constant 0 : index
    %c0_51 = arith.constant 0 : index
    %252 = vector.load %arg8[%c0_50, %c0_51] : memref<1x128xf32, #tpu.memory_space<vmem>>, vector<1x128xf32>
    %253 = vector.broadcast %252 : vector<1x128xf32> to vector<8x128xf32>
    %254 = arith.addf %251, %253 : vector<8x128xf32>
    %cst_52 = arith.constant 0.000000e+00 : f32
    %255 = vector.broadcast %cst_52 : f32 to vector<8x128xf32>
    %256 = arith.maximumf %254, %255 : vector<8x128xf32>
    %257 = arith.truncf %256 : vector<8x128xf32> to vector<8x128xbf16>
    %c0_53 = arith.constant 0 : index
    %c0_54 = arith.constant 0 : index
    %258 = vector.load %arg9[%c0_53, %c0_54] : memref<128x128xbf16, #tpu.memory_space<vmem>>, vector<128x128xbf16>
    %cst_55 = arith.constant dense<0.000000e+00> : vector<8x128xf32>
    %259 = tpu.matmul %257, %258, %cst_55 {dimension_numbers = #tpu.dot_dimension_numbers<[1], [0], [0], [1], [0, 0, 1, 1], [], []>} : vector<8x128xbf16>, vector<128x128xbf16>, vector<8x128xf32> -> vector<8x128xf32>
    %c0_56 = arith.constant 0 : index
    %c0_57 = arith.constant 0 : index
    %260 = vector.load %arg10[%c0_56, %c0_57] : memref<1x128xf32, #tpu.memory_space<vmem>>, vector<1x128xf32>
    %261 = vector.broadcast %260 : vector<1x128xf32> to vector<8x128xf32>
    %262 = arith.addf %259, %261 : vector<8x128xf32>
    %cst_58 = arith.constant dense<0xFF800000> : vector<8xf32>
    %263 = vector.multi_reduction <maximumf>, %262, %cst_58 [1] : vector<8x128xf32> to vector<8xf32>
    %264 = vector.shape_cast %263 : vector<8xf32> to vector<8x1xf32>
    %265 = vector.broadcast %264 : vector<8x1xf32> to vector<8x128xf32>
    %266 = arith.subf %262, %265 : vector<8x128xf32>
    %267 = math.exp %266 : vector<8x128xf32>
    %cst_59 = arith.constant dense<0.000000e+00> : vector<8xf32>
    %268 = vector.multi_reduction <add>, %267, %cst_59 [1] : vector<8x128xf32> to vector<8xf32>
    %269 = vector.shape_cast %268 : vector<8xf32> to vector<8x1xf32>
    %270 = tpu.reciprocal %269 {approx = true} : vector<8x1xf32> -> vector<8x1xf32>
    %271 = arith.mulf %269, %270 : vector<8x1xf32>
    %cst_60 = arith.constant 2.000000e+00 : f32
    %272 = vector.broadcast %cst_60 : f32 to vector<8x1xf32>
    %273 = arith.subf %272, %271 : vector<8x1xf32>
    %274 = arith.mulf %270, %273 : vector<8x1xf32>
    %275 = vector.broadcast %274 : vector<8x1xf32> to vector<8x128xf32>
    %276 = arith.mulf %267, %275 : vector<8x128xf32>
    %c0_61 = arith.constant 0 : index
    %c0_62 = arith.constant 0 : index
    %277 = vector.load %arg11[%c0_61, %c0_62] : memref<8x128xf32, #tpu.memory_space<vmem>>, vector<8x128xf32>
    tpu.vector_store %arg11[%c0_61, %c0_62], %276 {strides = array<i32>} : memref<8x128xf32, #tpu.memory_space<vmem>>, vector<8x128xf32>,
    return
  }
  func.func @transform_0(%arg0: i32) -> (i32, i32, i32) {
    %c0_i32 = arith.constant 0 : i32
    %c0_i32_0 = arith.constant 0 : i32
    %c0_i32_1 = arith.constant 0 : i32
    return %c0_i32, %arg0, %c0_i32_0 : i32, i32, i32
  }
  func.func @transform_1(%arg0: i32) -> (i32, i32) {
    %c0_i32 = arith.constant 0 : i32
    %c0_i32_0 = arith.constant 0 : i32
    return %arg0, %c0_i32 : i32, i32
  }
  func.func @transform_2(%arg0: i32) -> (i32, i32) {
    %c0_i32 = arith.constant 0 : i32
    %c0_i32_0 = arith.constant 0 : i32
    %c0_i32_1 = arith.constant 0 : i32
    return %c0_i32, %c0_i32_0 : i32, i32
  }
  func.func @transform_3(%arg0: i32) -> (i32, i32) {
    %c0_i32 = arith.constant 0 : i32
    %c0_i32_0 = arith.constant 0 : i32
    %c0_i32_1 = arith.constant 0 : i32
    return %c0_i32, %c0_i32_0 : i32, i32
  }
  func.func @transform_4(%arg0: i32) -> (i32, i32) {
    %c0_i32 = arith.constant 0 : i32
    %c0_i32_0 = arith.constant 0 : i32
    %c0_i32_1 = arith.constant 0 : i32
    return %c0_i32, %c0_i32_0 : i32, i32
  }
  func.func @transform_5(%arg0: i32) -> (i32, i32) {
    %c0_i32 = arith.constant 0 : i32
    %c0_i32_0 = arith.constant 0 : i32
    %c0_i32_1 = arith.constant 0 : i32
    return %c0_i32, %c0_i32_0 : i32, i32
  }
  func.func @transform_6(%arg0: i32) -> (i32, i32) {
    %c0_i32 = arith.constant 0 : i32
    %c0_i32_0 = arith.constant 0 : i32
    %c0_i32_1 = arith.constant 0 : i32
    return %c0_i32, %c0_i32_0 : i32, i32
  }
  func.func @transform_7(%arg0: i32) -> (i32, i32) {
    %c0_i32 = arith.constant 0 : i32
    %c0_i32_0 = arith.constant 0 : i32
    %c0_i32_1 = arith.constant 0 : i32
    return %c0_i32, %c0_i32_0 : i32, i32
  }
  func.func @transform_8(%arg0: i32) -> (i32, i32) {
    %c0_i32 = arith.constant 0 : i32
    %c0_i32_0 = arith.constant 0 : i32
    %c0_i32_1 = arith.constant 0 : i32
    return %c0_i32, %c0_i32_0 : i32, i32
  }
  func.func @transform_9(%arg0: i32) -> (i32, i32) {
    %c0_i32 = arith.constant 0 : i32
    %c0_i32_0 = arith.constant 0 : i32
    %c0_i32_1 = arith.constant 0 : i32
    return %c0_i32, %c0_i32_0 : i32, i32
  }
  func.func @transform_10(%arg0: i32) -> (i32, i32) {
    %c0_i32 = arith.constant 0 : i32
    %c0_i32_0 = arith.constant 0 : i32
    return %arg0, %c0_i32 : i32, i32
  }
}

</mosaic_0001>

<bundles_post_ra>
// kernel: mary_lstm_forward.1
= control target key start
LH: loop header
LB: loop body
LE: loop exit
PB: predicated region body
PF: predicated region fallthrough
CT: control target
= control target key end

     0   :  { %15 = vsyncpa [#allocation3], 0  ;;  %s2962_s0 = inlined_call_operand.vmem [shape: f32[8,8,32], index: 0, kind: input, shape index: {}]   ;;  %s2963_s1 = inlined_call_operand.vmem [shape: f32[8,32], index: 1, kind: input, shape index: {}]   ;;  %s2964_s2 = inlined_call_operand.vmem [shape: bf16[32,512], index: 2, kind: input, shape index: {}]   ;;  %s2965_s3 = inlined_call_operand.hbm [shape: bf16[128,512], index: 3, kind: input, shape index: {}]   ;;  %s2966_s4 = inlined_call_operand.vmem [shape: f32[1,512], index: 4, kind: input, shape index: {}]   ;;  %s2967_s5 = inlined_call_operand.vmem [shape: bf16[128,128], index: 5, kind: input, shape index: {}]   ;;  %s2968_s6 = inlined_call_operand.hbm [shape: bf16[32,128], index: 6, kind: input, shape index: {}]   ;;  %s2969_s7 = inlined_call_operand.vmem [shape: f32[1,128], index: 7, kind: input, shape index: {}]   ;;  %s2970_s8 = inlined_call_operand.hbm [shape: bf16[128,128], index: 8, kind: input, shape index: {}]   ;;  %s2971_s9 = inlined_call_operand.vmem [shape: f32[1,128], index: 9, kind: input, shape index: {}]   ;;  %s2972_s10 = inlined_call_operand.vmem [shape: f32[8,128], index: 10, kind: output, shape index: {}]  }
   0x1   :  { %16 = vsyncpa [#allocation5], 0  ;;  %s2187_s13 = smov [#allocation4]   ;;  %s2117_s17 = scalar_lea.hbm %s2968_s6, 256 }
   0x2   :  { %s44_s14 = sshll.u32 %s2187_s13, 4  ;;  %p2118_p0 = scmp.ne.s32.totalorder %s2968_s6, %s2117_s17  ;;  %s45_s14 = int_to_ptr.vmem [resolvable:$true] %s44_s14 }
   0x3   :  { %p2121_p1 = scmp.lt.u32.totalorder %s2117_s17, %s2968_s6 }
   0x5   :  { %p2123_p2 = pnand %p2121_p1, %p2118_p0 }
   0x7   :  { %2126 = shalt.err (!%p2123_p2)
}
   0x8   :  { %s2127_s22 = scalar_lea.vmem %s45_s14, 256  ;;  %p2132_p4 = scmp.lt.s32.totalorder %s45_s14, %s45_s14 }
   0x9   :  { %p2128_p3 = scmp.ne.s32.totalorder %s45_s14, %s2127_s22  ;;  %p2133_p5 = scmp.lt.s32.totalorder %s2127_s22, %s2127_s22 }
   0xb   :  { %p2134_p6 = por %p2133_p5, %p2132_p4 }
   0xd   :  { %p2135_p7 = pnand %p2134_p6, %p2128_p3 }
   0xf   :  { %2138 = shalt.err (!%p2135_p7)
}
  0x10   :  { %s2188_s23 = smov 64   ;;  %s2189_s24 = smov 4  }
  0x11   :  { %50 = dma.hbm_to_vmem [thread:$0]  %s2968_s6, 256, %s45_s14, [#allocation5], %s2188_s23, %s2188_s23, %s2189_s24  }
  0x12   :  { %s2190_s27 = smov [#allocation2]   ;;  %s2139_s11 = scalar_lea.hbm %s2965_s3, 4096 }
  0x13   :  { %s28_s28 = sshll.u32 %s2190_s27, 4  ;;  %p2140_p8 = scmp.ne.s32.totalorder %s2965_s3, %s2139_s11  ;;  %s29_s28 = int_to_ptr.vmem [resolvable:$true] %s28_s28 }
  0x14   :  { %p2143_p9 = scmp.lt.u32.totalorder %s2139_s11, %s2965_s3 }
  0x16   :  { %p2145_p10 = pnand %p2143_p9, %p2140_p8 }
  0x18   :  { %2148 = shalt.err (!%p2145_p10)
}
  0x19   :  { %s2149_s17 = scalar_lea.vmem %s29_s28, 4096  ;;  %p2154_p12 = scmp.lt.s32.totalorder %s29_s28, %s29_s28 }
  0x1a   :  { %p2150_p11 = scmp.ne.s32.totalorder %s29_s28, %s2149_s17  ;;  %p2155_p13 = scmp.lt.s32.totalorder %s2149_s17, %s2149_s17 }
  0x1c   :  { %p2156_p0 = por %p2155_p13, %p2154_p12 }
  0x1e   :  { %p2157_p1 = pnand %p2156_p0, %p2150_p11 }
  0x20   :  { %2160 = shalt.err (!%p2157_p1)
}
  0x21   :  { %s2191_s6 = smov 256   ;;  %s2192_s14 = smov 16  }
  0x22   :  { %34 = dma.hbm_to_vmem [thread:$0]  %s2965_s3, 4096, %s29_s28, [#allocation3], %s2191_s6, %s2191_s6, %s2192_s14  }
  0x23   :  { %s2193_s20 = smov [#allocation6]   ;;  %s2161_s26 = scalar_lea.hbm %s2970_s8, 1024 }
  0x24   :  { %s58_s21 = sshll.u32 %s2193_s20, 4  ;;  %p2162_p2 = scmp.ne.s32.totalorder %s2970_s8, %s2161_s26  ;;  %s59_s21 = int_to_ptr.vmem [resolvable:$true] %s58_s21 }
  0x25   :  { %p2165_p3 = scmp.lt.u32.totalorder %s2161_s26, %s2970_s8 }
  0x27   :  { %p2167_p4 = pnand %p2165_p3, %p2162_p2 }
  0x29   :  { %2170 = shalt.err (!%p2167_p4)
}
  0x2a   :  { %s2171_s12 = scalar_lea.vmem %s59_s21, 1024  ;;  %p2176_p6 = scmp.lt.s32.totalorder %s59_s21, %s59_s21 }
  0x2b   :  { %p2172_p5 = scmp.ne.s32.totalorder %s59_s21, %s2171_s12  ;;  %p2177_p7 = scmp.lt.s32.totalorder %s2171_s12, %s2171_s12 }
  0x2d   :  { %p2178_p8 = por %p2177_p7, %p2176_p6 }
  0x2f   :  { %p2179_p9 = pnand %p2178_p8, %p2172_p5 }
  0x31   :  { %2182 = shalt.err (!%p2179_p9)
}
  0x32   :  { %64 = dma.hbm_to_vmem [thread:$0]  %s2970_s8, 1024, %s59_s21, [#allocation5], %s2188_s23, %s2188_s23, %s2189_s24  }
  0x33   :  { %2183 = dma.done.wait [#allocation3], 4096  }
  0x34   :  { %2184 = vsyncadd [#allocation3], 4294963200 }
  0x35   :  { %2185 = dma.done.wait [#allocation5], 1280  }
  0x36   :  { %2186 = vsyncadd [#allocation5], 4294966016  ;;  %v2973_v0 = vmov 0   ;;  %v1875_v1 = vld [vmem:[%s2964_s2 + $0x4] ss:$16 sps:$4 sm:$0xff]   ;;  %v110_v10 = vld [vmem:[%s2962_s0 + $0x8] sm:$0xff]  ;;  %v131_v53 = vlaneseq }
  0x37   :  { %236 = vmatprep.mubr.bf16.mxu0 %v2973_v0  ;;  %309 = vmatprep.mubr.bf16.mxu1 %v2973_v0  ;;  %v1877_v2 = vld [vmem:[%s2964_s2 + $0xc] ss:$16 sps:$4 sm:$0xff]   ;;  %v1879_v3 = vld [vmem:[%s2964_s2] ss:$16 sps:$4 sm:$0xff]   ;;  %v1880_v4 = vld [vmem:[%s2964_s2 + $0x8] ss:$16 sps:$4 sm:$0xff]  }
  0x38   :  { %204 = vmatprep.subr.bf16.mxu0 %v1875_v1  ;;  %277 = vmatprep.subr.bf16.mxu1 %v1877_v2  ;;  %v1881_v5 = vld [vmem:[%s2964_s2 + $0x24] ss:$16 sps:$4 sm:$0xff]   ;;  %v1883_v6 = vld [vmem:[%s2964_s2 + $0x2c] ss:$16 sps:$4 sm:$0xff]   ;;  %v1885_v7 = vld [vmem:[%s2964_s2 + $0x20] ss:$16 sps:$4 sm:$0xff]  }
  0x39   :  { %205 = vmatpush1.bf16.msra.mxu0 %v1879_v3  ;;  %278 = vmatpush1.bf16.msra.mxu1 %v1880_v4  ;;  %v1886_v8 = vld [vmem:[%s2964_s2 + $0x28] ss:$16 sps:$4 sm:$0xff]   ;;  %v109_v9 = vld [vmem:[%s2962_s0] sm:$0xff]  ;;  %v2328_v13 = vld [vmem:[#allocation2 + $0xc] ss:$16 sps:$4 sm:$0xff]   ;;  %vm191_vm0 = vcmask 261120  }
  0x3a   :  { %206 = vmatprep.subr.bf16.mxu0 %v1881_v5  ;;  %279 = vmatprep.subr.bf16.mxu1 %v1883_v6  ;;  %v2326_v11 = vld [vmem:[#allocation2 + $0x4] ss:$16 sps:$4 sm:$0xff]   ;;  %v117_v12 = vpack.c.bf16 %v110_v10, %v109_v9  ;;  %v2330_v14 = vld [vmem:[#allocation2] ss:$16 sps:$4 sm:$0xff]   ;;  %v2332_v15 = vld [vmem:[#allocation2 + $0x8] ss:$16 sps:$4 sm:$0xff]  }
  0x3b   :  { %v2336_v16 = vld [vmem:[#allocation2 + $0x24] ss:$16 sps:$4 sm:$0xff]   ;;  %v2338_v17 = vld [vmem:[#allocation2 + $0x2c] ss:$16 sps:$4 sm:$0xff]   ;;  %v2340_v18 = vld [vmem:[#allocation2 + $0x20] ss:$16 sps:$4 sm:$0xff]  }
  0x3c   :  { %v2344_v19 = vld [vmem:[#allocation2 + $0x28] ss:$16 sps:$4 sm:$0xff]   ;;  %v111_v20 = vld [vmem:[%s2962_s0 + $0x10] sm:$0xff]  ;;  %v2358_v23 = vld [vmem:[#allocation2 + $0x4c] ss:$16 sps:$4 sm:$0xff]   ;;  %v132_v54 = vshrl.u32 %v131_v53, 7 }
  0x3d   :  { %207 = vmatpush1.bf16.msra.mxu0 %v1885_v7  ;;  %280 = vmatpush1.bf16.msra.mxu1 %v1886_v8  ;;  %v112_v21 = vld [vmem:[%s2962_s0 + $0x18] sm:$0xff]  ;;  %v2354_v22 = vld [vmem:[#allocation2 + $0x44] ss:$16 sps:$4 sm:$0xff]   ;;  %v2364_v25 = vld [vmem:[#allocation2 + $0x40] ss:$16 sps:$4 sm:$0xff]   ;;  %vm2196_vm1 = vmmov 0  }
  0x3e   :  { %510 = vmatprep.subr.bf16.mxu0 %v2326_v11  ;;  %551 = vmatprep.subr.bf16.mxu1 %v2328_v13  ;;  %v118_v24 = vpack.c.bf16 %v112_v21, %v111_v20  ;;  %v2366_v26 = vld [vmem:[#allocation2 + $0x48] ss:$16 sps:$4 sm:$0xff]   ;;  %v2370_v27 = vld [vmem:[#allocation2 + $0x64] ss:$16 sps:$4 sm:$0xff]   ;;  %v2372_v28 = vld [vmem:[#allocation2 + $0x6c] ss:$16 sps:$4 sm:$0xff]  }
  0x3f   :  { %v2374_v29 = vld [vmem:[#allocation2 + $0x60] ss:$16 sps:$4 sm:$0xff]   ;;  %v2376_v30 = vld [vmem:[#allocation2 + $0x68] ss:$16 sps:$4 sm:$0xff]   ;;  %v2388_v33 = vld [vmem:[#allocation2 + $0x84] ss:$16 sps:$4 sm:$0xff]  }
  0x40   :  { %1711 = vmatmul.mubr.msk.bf16.vlgmr.msra.gmra.mrb[0].mxu0 %vm191_vm0, %v117_v12  ;;  %1715 = vmatmul.mubr.msk.bf16.vlgmr.msra.gmra.mrb[0].mxu1 %vm191_vm0, %v117_v12  ;;  %v113_v31 = vld [vmem:[%s2962_s0 + $0x20] sm:$0xff]  ;;  %v114_v32 = vld [vmem:[%s2962_s0 + $0x28] sm:$0xff]  ;;  %v115_v42 = vld [vmem:[%s2962_s0 + $0x30] sm:$0xff]  ;;  %v141_v55 = vsub.s32 2, %v132_v54  ;;  %v145_v56 = vsub.s32 3, %v132_v54  ;;  %v133_v57 = vsub.s32 0, %v132_v54 }
  0x41   :  { %511 = vmatpush1.bf16.msra.mxu0 %v2330_v14  ;;  %552 = vmatpush1.bf16.msra.mxu1 %v2332_v15  ;;  %v2392_v34 = vld [vmem:[#allocation2 + $0x8c] ss:$16 sps:$4 sm:$0xff]   ;;  %v119_v35 = vpack.c.bf16 %v114_v32, %v113_v31  ;;  %v2396_v36 = vld [vmem:[#allocation2 + $0x80] ss:$16 sps:$4 sm:$0xff]   ;;  %v2398_v37 = vld [vmem:[#allocation2 + $0x88] ss:$16 sps:$4 sm:$0xff]  }
  0x42   :  { %512 = vmatprep.subr.bf16.mxu0 %v2336_v16  ;;  %553 = vmatprep.subr.bf16.mxu1 %v2338_v17  ;;  %v2402_v38 = vld [vmem:[#allocation2 + $0xa4] ss:$16 sps:$4 sm:$0xff]   ;;  %v2406_v39 = vld [vmem:[#allocation2 + $0xac] ss:$16 sps:$4 sm:$0xff]   ;;  %v2408_v40 = vld [vmem:[#allocation2 + $0xa0] ss:$16 sps:$4 sm:$0xff]  }
  0x43   :  { %246 = vmatprep.mubr.bf16.mxu0 %v2973_v0  ;;  %319 = vmatprep.mubr.bf16.mxu1 %v2973_v0  ;;  %v2412_v41 = vld [vmem:[#allocation2 + $0xa8] ss:$16 sps:$4 sm:$0xff]   ;;  %v2424_v44 = vld [vmem:[#allocation2 + $0xc4] ss:$16 sps:$4 sm:$0xff]   ;;  %v2426_v45 = vld [vmem:[#allocation2 + $0xcc] ss:$16 sps:$4 sm:$0xff]  }
  0x44   :  { %v116_v43 = vld [vmem:[%s2962_s0 + $0x38] sm:$0xff]  ;;  %v2430_v46 = vld [vmem:[#allocation2 + $0xc0] ss:$16 sps:$4 sm:$0xff]   ;;  %v2434_v49 = vld [vmem:[#allocation2 + $0xe4] ss:$16 sps:$4 sm:$0xff]   ;;  %v137_v59 = vsub.s32 1, %v132_v54 }
  0x45   :  { %513 = vmatpush1.bf16.msra.mxu0 %v2340_v18  ;;  %554 = vmatpush1.bf16.msra.mxu1 %v2344_v19  ;;  %v2432_v47 = vld [vmem:[#allocation2 + $0xc8] ss:$16 sps:$4 sm:$0xff]   ;;  %v120_v48 = vpack.c.bf16 %v116_v43, %v115_v42  ;;  %v2436_v50 = vld [vmem:[#allocation2 + $0xec] ss:$16 sps:$4 sm:$0xff]   ;;  %v2442_v51 = vld [vmem:[#allocation2 + $0xe0] ss:$16 sps:$4 sm:$0xff]  }
  0x46   :  { %514 = vmatprep.subr.bf16.mxu0 %v2354_v22  ;;  %555 = vmatprep.subr.bf16.mxu1 %v2358_v23  ;;  %v2444_v52 = vld [vmem:[#allocation2 + $0xe8] ss:$16 sps:$4 sm:$0xff]   ;;  %v129_v58 = vld [vmem:[%s2966_s4] sm:$0xf] }
  0x47   :  { %v2497_v60 = vrot.slane %v129_v58, %v141_v55  ;;  %v2503_v63 = vrot.slane %v129_v58, %v145_v56  ;;  %v134_v1 = vrot.slane %v129_v58, %v133_v57  ;;  %v138_v4 = vrot.slane %v129_v58, %v137_v59 }
  0x48   :  { %1712 = vmatmul.mubr.msk.bf16.gmra.mrb[4].mxu0 %vm191_vm0, %v118_v24  ;;  %1716 = vmatmul.mubr.msk.bf16.gmra.mrb[4].mxu1 %vm191_vm0, %v118_v24 }
  0x49   :  { %515 = vmatpush1.bf16.msra.mxu0 %v2364_v25  ;;  %556 = vmatpush1.bf16.msra.mxu1 %v2366_v26 }
  0x4a   :  { %516 = vmatprep.subr.bf16.mxu0 %v2370_v27  ;;  %557 = vmatprep.subr.bf16.mxu1 %v2372_v28 }
  0x4b   :  { %256 = vmatprep.mubr.bf16.mxu0 %v2973_v0  ;;  %329 = vmatprep.mubr.bf16.mxu1 %v2973_v0 }
  0x4d   :  { %517 = vmatpush1.bf16.msra.mxu0 %v2374_v29  ;;  %558 = vmatpush1.bf16.msra.mxu1 %v2376_v30 }
  0x4e   :  { %518 = vmatprep.subr.bf16.mxu0 %v2388_v33  ;;  %559 = vmatprep.subr.bf16.mxu1 %v2392_v34 }
  0x50   :  { %1713 = vmatmul.mubr.msk.bf16.gmra.mrb[8].mxu0 %vm191_vm0, %v119_v35  ;;  %1717 = vmatmul.mubr.msk.bf16.gmra.mrb[8].mxu1 %vm191_vm0, %v119_v35 }
  0x51   :  { %519 = vmatpush1.bf16.msra.mxu0 %v2396_v36  ;;  %560 = vmatpush1.bf16.msra.mxu1 %v2398_v37 }
  0x52   :  { %520 = vmatprep.subr.bf16.mxu0 %v2402_v38  ;;  %561 = vmatprep.subr.bf16.mxu1 %v2406_v39 }
  0x53   :  { %266 = vmatprep.mubr.bf16.mxu0 %v2973_v0  ;;  %339 = vmatprep.mubr.bf16.mxu1 %v2973_v0 }
  0x55   :  { %521 = vmatpush1.bf16.msra.mxu0 %v2408_v40  ;;  %562 = vmatpush1.bf16.msra.mxu1 %v2412_v41 }
  0x56   :  { %522 = vmatprep.subr.bf16.mxu0 %v2424_v44  ;;  %563 = vmatprep.subr.bf16.mxu1 %v2426_v45 }
  0x58   :  { %1714 = vmatmul.mubr.msk.bf16.gmra.mrb[12].mxu0 %vm191_vm0, %v120_v48  ;;  %1718 = vmatmul.mubr.msk.bf16.gmra.mrb[12].mxu1 %vm191_vm0, %v120_v48 }
  0x59   :  { %523 = vmatpush1.bf16.msra.mxu0 %v2430_v46  ;;  %564 = vmatpush1.bf16.msra.mxu1 %v2432_v47 }
  0x5a   :  { %524 = vmatprep.subr.bf16.mxu0 %v2434_v49  ;;  %565 = vmatprep.subr.bf16.mxu1 %v2436_v50 }
  0x5b   :  { %542 = vmatprep.mubr.bf16.mxu0 %v2973_v0  ;;  %583 = vmatprep.mubr.bf16.mxu1 %v2973_v0 }
  0x5d   :  { %525 = vmatpush1.bf16.msra.mxu0 %v2442_v51  ;;  %566 = vmatpush1.bf16.msra.mxu1 %v2444_v52 }
  0x5e   :  { %621 = vmatprep.subr.bf16.mxu0 %v2326_v11  ;;  %662 = vmatprep.subr.bf16.mxu1 %v2328_v13 }
  0x60   :  { %543 = vmatmul.mubr.bf16.vlgmr.msra.gmra.mrb[16].mxu0 %v2973_v0  ;;  %584 = vmatmul.mubr.bf16.vlgmr.msra.gmra.mrb[16].mxu1 %v2973_v0 }
  0x61   :  { %622 = vmatpush1.bf16.msra.mxu0 %v2330_v14  ;;  %663 = vmatpush1.bf16.msra.mxu1 %v2332_v15 }
  0x62   :  { %623 = vmatprep.subr.bf16.mxu0 %v2336_v16  ;;  %664 = vmatprep.subr.bf16.mxu1 %v2338_v17 }
  0x63   :  { %653 = vmatprep.mubr.bf16.mxu0 %v2973_v0  ;;  %694 = vmatprep.mubr.bf16.mxu1 %v2973_v0 }
  0x65   :  { %624 = vmatpush1.bf16.msra.mxu0 %v2340_v18  ;;  %665 = vmatpush1.bf16.msra.mxu1 %v2344_v19 }
  0x66   :  { %625 = vmatprep.subr.bf16.mxu0 %v2354_v22  ;;  %666 = vmatprep.subr.bf16.mxu1 %v2358_v23 }
  0x69   :  { %626 = vmatpush1.bf16.msra.mxu0 %v2364_v25  ;;  %667 = vmatpush1.bf16.msra.mxu1 %v2366_v26 }
  0x6a   :  { %627 = vmatprep.subr.bf16.mxu0 %v2370_v27  ;;  %668 = vmatprep.subr.bf16.mxu1 %v2372_v28 }
  0x6d   :  { %628 = vmatpush1.bf16.msra.mxu0 %v2374_v29  ;;  %669 = vmatpush1.bf16.msra.mxu1 %v2376_v30 }
  0x6e   :  { %629 = vmatprep.subr.bf16.mxu0 %v2388_v33  ;;  %670 = vmatprep.subr.bf16.mxu1 %v2392_v34 }
  0x71   :  { %630 = vmatpush1.bf16.msra.mxu0 %v2396_v36  ;;  %671 = vmatpush1.bf16.msra.mxu1 %v2398_v37 }
  0x72   :  { %631 = vmatprep.subr.bf16.mxu0 %v2402_v38  ;;  %672 = vmatprep.subr.bf16.mxu1 %v2406_v39 }
  0x75   :  { %632 = vmatpush1.bf16.msra.mxu0 %v2408_v40  ;;  %673 = vmatpush1.bf16.msra.mxu1 %v2412_v41 }
  0x76   :  { %633 = vmatprep.subr.bf16.mxu0 %v2424_v44  ;;  %674 = vmatprep.subr.bf16.mxu1 %v2426_v45 }
  0x79   :  { %634 = vmatpush1.bf16.msra.mxu0 %v2430_v46  ;;  %675 = vmatpush1.bf16.msra.mxu1 %v2432_v47 }
  0x7a   :  { %635 = vmatprep.subr.bf16.mxu0 %v2434_v49  ;;  %676 = vmatprep.subr.bf16.mxu1 %v2436_v50 }
  0x7d   :  { %636 = vmatpush1.bf16.msra.mxu0 %v2442_v51  ;;  %677 = vmatpush1.bf16.msra.mxu1 %v2444_v52 }
  0x7e   :  { %732 = vmatprep.subr.bf16.mxu0 %v2326_v11  ;;  %773 = vmatprep.subr.bf16.mxu1 %v2328_v13 }
 0x113   :  { %v2499_v61 = vpop.f32.mrb[0].mxu0  ;;  %v2501_v62 = vpop.f32.mrb[0].mxu1 }
 0x114   :  { %v240_v2 = vpop.f32.mrb[1].mxu0  ;;  %v313_v3 = vpop.f32.mrb[1].mxu1 }
 0x115   :  { %v242_v5 = vpop.f32.mrb[2].mxu0  ;;  %v315_v6 = vpop.f32.mrb[2].mxu1 }
 0x116   :  { %v2505_v7 = vadd.f32 %v242_v5, %v134_v1  ;;  %v244_v8 = vpop.f32.mrb[3].mxu0  ;;  %v2508_v9 = vadd.f32 %v315_v6, %v2497_v60  ;;  %v317_v10 = vpop.f32.mrb[3].mxu1 }
 0x117   :  { %v2510_v12 = vadd.f32 %v244_v8, %v138_v4  ;;  %v2513_v20 = vadd.f32 %v317_v10, %v2503_v63 }
 0x11b   :  { %v248_v21 = vpop.f32.mrb[4].mxu0  ;;  %v321_v24 = vpop.f32.mrb[4].mxu1 }
 0x11c   :  { %v2515_v31 = vadd.f32 %v248_v21, %v134_v1  ;;  %v250_v32 = vpop.f32.mrb[5].mxu0  ;;  %v2518_v35 = vadd.f32 %v321_v24, %v2497_v60  ;;  %v323_v42 = vpop.f32.mrb[5].mxu1 }
 0x11d   :  { %v2520_v43 = vadd.f32 %v250_v32, %v138_v4  ;;  %v252_v48 = vpop.f32.mrb[6].mxu0  ;;  %v2523_v53 = vadd.f32 %v323_v42, %v2503_v63  ;;  %v325_v54 = vpop.f32.mrb[6].mxu1 }
 0x11e   :  { %v2525_v55 = vadd.f32 %v252_v48, %v134_v1  ;;  %v254_v56 = vpop.f32.mrb[7].mxu0  ;;  %v2528_v57 = vadd.f32 %v325_v54, %v2497_v60  ;;  %v327_v58 = vpop.f32.mrb[7].mxu1 }
 0x11f   :  { %2975 = vst [vmem:[#allocation9_spill] sm:$0xff] %v2523_v53  ;;  %v2530_v59 = vadd.f32 %v254_v56, %v138_v4  ;;  %v2533_v5 = vadd.f32 %v327_v58, %v2503_v63 }
 0x120   :  { %2976 = vst [vmem:[#allocation10_spill] sm:$0xff] %v2525_v55  ;;  %2977 = vst [vmem:[#allocation11_spill] sm:$0xff] %v2528_v57 }
 0x121   :  { %2978 = vst [vmem:[#allocation12_spill] sm:$0xff] %v2530_v59  ;;  %2979 = vst [vmem:[#allocation13_spill] sm:$0xff] %v2533_v5 }
 0x123   :  { %v258_v6 = vpop.f32.mrb[8].mxu0  ;;  %v331_v8 = vpop.f32.mrb[8].mxu1 }
 0x124   :  { %v2535_v10 = vadd.f32 %v258_v6, %v134_v1  ;;  %v260_v21 = vpop.f32.mrb[9].mxu0  ;;  %v2538_v24 = vadd.f32 %v331_v8, %v2497_v60  ;;  %v333_v32 = vpop.f32.mrb[9].mxu1 }
 0x125   :  { %v2540_v42 = vadd.f32 %v260_v21, %v138_v4  ;;  %v262_v48 = vpop.f32.mrb[10].mxu0  ;;  %v2543_v54 = vadd.f32 %v333_v32, %v2503_v63  ;;  %v335_v56 = vpop.f32.mrb[10].mxu1 }
 0x126   :  { %2980 = vst [vmem:[#allocation14_spill] sm:$0xff] %v2535_v10  ;;  %2981 = vst [vmem:[#allocation15_spill] sm:$0xff] %v2538_v24  ;;  %v2545_v0 = vadd.f32 %v262_v48, %v134_v1  ;;  %v264_v58 = vpop.f32.mrb[11].mxu0  ;;  %v2548_v5 = vadd.f32 %v335_v56, %v2497_v60  ;;  %v337_v6 = vpop.f32.mrb[11].mxu1 }
 0x127   :  { %2982 = vst [vmem:[#allocation16_spill] sm:$0xff] %v2540_v42  ;;  %2983 = vst [vmem:[#allocation17_spill] sm:$0xff] %v2543_v54  ;;  %v2550_v10 = vadd.f32 %v264_v58, %v138_v4  ;;  %v2553_v8 = vadd.f32 %v337_v6, %v2503_v63 }
 0x128   :  { %2984 = vst [vmem:[#allocation18_spill] sm:$0xff] %v2545_v0  ;;  %2985 = vst [vmem:[#allocation19_spill] sm:$0xff] %v2548_v5 }
 0x129   :  { %2986 = vst [vmem:[#allocation20_spill] sm:$0xff] %v2550_v10  ;;  %2987 = vst [vmem:[#allocation21_spill] sm:$0xff] %v2553_v8 }
 0x12b   :  { %v268_v24 = vpop.f32.mrb[12].mxu0  ;;  %v341_v21 = vpop.f32.mrb[12].mxu1 }
 0x12c   :  { %v2555_v42 = vadd.f32 %v268_v24, %v134_v1  ;;  %v270_v59 = vpop.f32.mrb[13].mxu0  ;;  %v2558_v32 = vadd.f32 %v341_v21, %v2497_v60  ;;  %v343_v48 = vpop.f32.mrb[13].mxu1 }
 0x12d   :  { %v2560_v0 = vadd.f32 %v270_v59, %v138_v4  ;;  %v272_v54 = vpop.f32.mrb[14].mxu0  ;;  %v2563_v56 = vadd.f32 %v343_v48, %v2503_v63  ;;  %v345_v58 = vpop.f32.mrb[14].mxu1  ;;  %v239_v59 = vadd.f32 %v2499_v61, %v134_v1  ;;  %v241_v48 = vadd.f32 %v240_v2, %v138_v4 }
 0x12e   :  { %2988 = vst [vmem:[#allocation22_spill] sm:$0xff] %v2555_v42  ;;  %2989 = vst [vmem:[#allocation23_spill] sm:$0xff] %v2558_v32  ;;  %v2565_v10 = vadd.f32 %v272_v54, %v134_v1  ;;  %v274_v6 = vpop.f32.mrb[15].mxu0  ;;  %v2568_v8 = vadd.f32 %v345_v58, %v2497_v60  ;;  %v347_v24 = vpop.f32.mrb[15].mxu1 }
 0x12f   :  { %2990 = vst [vmem:[#allocation24_spill] sm:$0xff] %v2560_v0  ;;  %2991 = vst [vmem:[#allocation25_spill] sm:$0xff] %v2563_v56  ;;  %v2570_v42 = vadd.f32 %v274_v6, %v138_v4  ;;  %v2573_v21 = vadd.f32 %v347_v24, %v2503_v63  ;;  %v312_v0 = vadd.f32 %v2501_v62, %v2497_v60 }
 0x130   :  { %2992 = vst [vmem:[#allocation26_spill] sm:$0xff] %v2565_v10  ;;  %2993 = vst [vmem:[#allocation27_spill] sm:$0xff] %v2568_v8  ;;  %v314_v56 = vadd.f32 %v313_v3, %v2503_v63 }
 0x131   :  { %2994 = vst [vmem:[#allocation28_spill] sm:$0xff] %v2570_v42  ;;  %2995 = vst [vmem:[#allocation29_spill] sm:$0xff] %v2573_v21 }
 0x133   :  { %v544_v54 = vpop.f32.mrb[16].mxu0  ;;  %v585_v10 = vpop.f32.mrb[16].mxu1 }
 0x134   :  { %v592_v32 = vadd.f32 %v544_v54, %v239_v59  ;;  %v594_v5 = vadd.f32 %v585_v10, %v312_v0  ;;  %v546_v58 = vpop.f32.mrb[17].mxu0  ;;  %v587_v8 = vpop.f32.mrb[17].mxu1 }
 0x135   :  { %v593_v57 = vadd.f32 %v546_v58, %v241_v48  ;;  %v595_v6 = vadd.f32 %v587_v8, %v314_v56  ;;  %v548_v42 = vpop.f32.mrb[18].mxu0  ;;  %v589_v55 = vpop.f32.mrb[18].mxu1 }
 0x136   :  { %v1751_v24 = vmul.f32 -1.442695, %v592_v32  ;;  %v549_v21 = vpop.f32.mrb[19].mxu0  ;;  %v590_v53 = vpop.f32.mrb[19].mxu1 }
 0x137   :  { %v1752_v61 = vmul.f32 -1.442695, %v593_v57  ;;  %v1753_v60 = vmul.f32 -1.442695, %v595_v6 }
 0x138   :  { %1953 = vpow2.f32 %v1751_v24 }
 0x139   :  { %1955 = vpow2.f32 %v1752_v61 }
 0x13a   :  { %1957 = vpow2.f32 %v1753_v60 }
 0x13b   :  { %1959 = vtanh.f32 %v594_v5  ;;  %v2996_v5 = vmov 0  }
 0x142   :  { %v1954_v62 = vpop.eup %1953 }
 0x143   :  { %v1956_v1 = vpop.eup %1955  ;;  %v599_v63 = vadd.f32 1.0, %v1954_v62 }
 0x144   :  { %v605_v2 = vadd.f32 1.0, %v1956_v1  ;;  %v1958_v0 = vpop.eup %1957 }
 0x145   :  { %1961 = vrcp.f32 %v599_v63  ;;  %v1960_v3 = vpop.eup %1959  ;;  %v612_v42 = vadd.f32 1.0, %v1958_v0 }
 0x146   :  { %1963 = vrcp.f32 %v605_v2 }
 0x147   :  { %1965 = vrcp.f32 %v612_v42 }
 0x14f   :  { %v1962_v4 = vpop.eup %1961 }
 0x150   :  { %v1964_v10 = vpop.eup %1963  ;;  %v616_v55 = vmul.f32 %v1962_v4, %v1960_v3 }
 0x151   :  { %v615_v8 = vmul.f32 0.0, %v1964_v10  ;;  %v1966_v57 = vpop.eup %1965 }
 0x153   :  { %v2579_v53 = vadd.f32 %v616_v55, %v615_v8 }
 0x155   :  { %1967 = vtanh.f32 %v2579_v53 }
 0x15f   :  { %v1968_v32 = vpop.eup %1967 }
 0x160   :  { %v619_v56 = vmul.f32 %v1968_v32, %v1966_v57 }
 0x162   :  { %v620_v21 = vpack.c.bf16 %v619_v56, %v619_v56 }
 0x164   :  { %654 = vmatmul.mubr.bf16.vlgmr.msra.gmra.mrb[20].mxu0 %v620_v21  ;;  %695 = vmatmul.mubr.bf16.vlgmr.msra.gmra.mrb[20].mxu1 %v620_v21 }
 0x165   :  { %733 = vmatpush1.bf16.msra.mxu0 %v2330_v14  ;;  %774 = vmatpush1.bf16.msra.mxu1 %v2332_v15 }
 0x166   :  { %734 = vmatprep.subr.bf16.mxu0 %v2336_v16  ;;  %775 = vmatprep.subr.bf16.mxu1 %v2338_v17 }
 0x167   :  { %764 = vmatprep.mubr.bf16.mxu0 %v2996_v5  ;;  %805 = vmatprep.mubr.bf16.mxu1 %v2996_v5 }
 0x169   :  { %735 = vmatpush1.bf16.msra.mxu0 %v2340_v18  ;;  %776 = vmatpush1.bf16.msra.mxu1 %v2344_v19 }
 0x16a   :  { %736 = vmatprep.subr.bf16.mxu0 %v2354_v22  ;;  %777 = vmatprep.subr.bf16.mxu1 %v2358_v23 }
 0x16d   :  { %737 = vmatpush1.bf16.msra.mxu0 %v2364_v25  ;;  %778 = vmatpush1.bf16.msra.mxu1 %v2366_v26 }
 0x16e   :  { %738 = vmatprep.subr.bf16.mxu0 %v2370_v27  ;;  %779 = vmatprep.subr.bf16.mxu1 %v2372_v28 }
 0x171   :  { %739 = vmatpush1.bf16.msra.mxu0 %v2374_v29  ;;  %780 = vmatpush1.bf16.msra.mxu1 %v2376_v30 }
 0x172   :  { %740 = vmatprep.subr.bf16.mxu0 %v2388_v33  ;;  %781 = vmatprep.subr.bf16.mxu1 %v2392_v34 }
 0x175   :  { %741 = vmatpush1.bf16.msra.mxu0 %v2396_v36  ;;  %782 = vmatpush1.bf16.msra.mxu1 %v2398_v37 }
 0x176   :  { %742 = vmatprep.subr.bf16.mxu0 %v2402_v38  ;;  %783 = vmatprep.subr.bf16.mxu1 %v2406_v39 }
 0x179   :  { %743 = vmatpush1.bf16.msra.mxu0 %v2408_v40  ;;  %784 = vmatpush1.bf16.msra.mxu1 %v2412_v41 }
 0x17a   :  { %744 = vmatprep.subr.bf16.mxu0 %v2424_v44  ;;  %785 = vmatprep.subr.bf16.mxu1 %v2426_v45 }
 0x17d   :  { %745 = vmatpush1.bf16.msra.mxu0 %v2430_v46  ;;  %786 = vmatpush1.bf16.msra.mxu1 %v2432_v47 }
 0x17e   :  { %746 = vmatprep.subr.bf16.mxu0 %v2434_v49  ;;  %787 = vmatprep.subr.bf16.mxu1 %v2436_v50 }
 0x181   :  { %747 = vmatpush1.bf16.msra.mxu0 %v2442_v51  ;;  %788 = vmatpush1.bf16.msra.mxu1 %v2444_v52 }
 0x182   :  { %843 = vmatprep.subr.bf16.mxu0 %v2326_v11  ;;  %884 = vmatprep.subr.bf16.mxu1 %v2328_v13 }
 0x237   :  { %v655_v59 = vpop.f32.mrb[20].mxu0  ;;  %v696_v48 = vpop.f32.mrb[20].mxu1 }
 0x238   :  { %v703_v54 = vadd.f32 %v655_v59, %v2505_v7  ;;  %v705_v58 = vadd.f32 %v696_v48, %v2508_v9  ;;  %v657_v6 = vpop.f32.mrb[21].mxu0  ;;  %v698_v24 = vpop.f32.mrb[21].mxu1 }
 0x239   :  { %v704_v61 = vadd.f32 %v657_v6, %v2510_v12  ;;  %v706_v60 = vadd.f32 %v698_v24, %v2513_v20  ;;  %v659_v62 = vpop.f32.mrb[22].mxu0  ;;  %v700_v1 = vpop.f32.mrb[22].mxu1 }
 0x23a   :  { %v1754_v63 = vmul.f32 -1.442695, %v703_v54  ;;  %v660_v2 = vpop.f32.mrb[23].mxu0  ;;  %v701_v0 = vpop.f32.mrb[23].mxu1 }
 0x23b   :  { %v1755_v3 = vmul.f32 -1.442695, %v704_v61  ;;  %v1756_v4 = vmul.f32 -1.442695, %v706_v60 }
 0x23c   :  { %1969 = vpow2.f32 %v1754_v63  ;;  %v2997_v63 = vld [vmem:[#allocation9_spill] sm:$0xff] }
 0x23d   :  { %1971 = vpow2.f32 %v1755_v3 }
 0x23e   :  { %1973 = vpow2.f32 %v1756_v4 }
 0x23f   :  { %1975 = vtanh.f32 %v705_v58 }
 0x246   :  { %v1970_v10 = vpop.eup %1969 }
 0x247   :  { %v1972_v55 = vpop.eup %1971  ;;  %v710_v7 = vadd.f32 1.0, %v1970_v10 }
 0x248   :  { %v716_v9 = vadd.f32 1.0, %v1972_v55  ;;  %v1974_v12 = vpop.eup %1973 }
 0x249   :  { %1977 = vrcp.f32 %v710_v7  ;;  %v1976_v42 = vpop.eup %1975  ;;  %v723_v32 = vadd.f32 1.0, %v1974_v12 }
 0x24a   :  { %1979 = vrcp.f32 %v716_v9 }
 0x24b   :  { %1981 = vrcp.f32 %v723_v32 }
 0x253   :  { %v1978_v20 = vpop.eup %1977 }
 0x254   :  { %v1980_v8 = vpop.eup %1979  ;;  %v727_v57 = vmul.f32 %v1978_v20, %v1976_v42 }
 0x255   :  { %v726_v56 = vmul.f32 %v1980_v8, %v2579_v53  ;;  %v1982_v59 = vpop.eup %1981 }
 0x257   :  { %v2621_v21 = vadd.f32 %v727_v57, %v726_v56 }
 0x259   :  { %1983 = vtanh.f32 %v2621_v21 }
 0x263   :  { %v1984_v48 = vpop.eup %1983 }
 0x264   :  { %v730_v54 = vmul.f32 %v1984_v48, %v1982_v59 }
 0x266   :  { %v731_v58 = vpack.c.bf16 %v730_v54, %v730_v54 }
 0x268   :  { %765 = vmatmul.mubr.bf16.vlgmr.msra.gmra.mrb[24].mxu0 %v731_v58  ;;  %806 = vmatmul.mubr.bf16.vlgmr.msra.gmra.mrb[24].mxu1 %v731_v58 }
 0x269   :  { %844 = vmatpush1.bf16.msra.mxu0 %v2330_v14  ;;  %885 = vmatpush1.bf16.msra.mxu1 %v2332_v15 }
 0x26a   :  { %845 = vmatprep.subr.bf16.mxu0 %v2336_v16  ;;  %886 = vmatprep.subr.bf16.mxu1 %v2338_v17 }
 0x26b   :  { %875 = vmatprep.mubr.bf16.mxu0 %v2996_v5  ;;  %916 = vmatprep.mubr.bf16.mxu1 %v2996_v5 }
 0x26d   :  { %846 = vmatpush1.bf16.msra.mxu0 %v2340_v18  ;;  %887 = vmatpush1.bf16.msra.mxu1 %v2344_v19 }
 0x26e   :  { %847 = vmatprep.subr.bf16.mxu0 %v2354_v22  ;;  %888 = vmatprep.subr.bf16.mxu1 %v2358_v23 }
 0x271   :  { %848 = vmatpush1.bf16.msra.mxu0 %v2364_v25  ;;  %889 = vmatpush1.bf16.msra.mxu1 %v2366_v26 }
 0x272   :  { %849 = vmatprep.subr.bf16.mxu0 %v2370_v27  ;;  %890 = vmatprep.subr.bf16.mxu1 %v2372_v28 }
 0x275   :  { %850 = vmatpush1.bf16.msra.mxu0 %v2374_v29  ;;  %891 = vmatpush1.bf16.msra.mxu1 %v2376_v30 }
 0x276   :  { %851 = vmatprep.subr.bf16.mxu0 %v2388_v33  ;;  %892 = vmatprep.subr.bf16.mxu1 %v2392_v34 }
 0x279   :  { %852 = vmatpush1.bf16.msra.mxu0 %v2396_v36  ;;  %893 = vmatpush1.bf16.msra.mxu1 %v2398_v37 }
 0x27a   :  { %853 = vmatprep.subr.bf16.mxu0 %v2402_v38  ;;  %894 = vmatprep.subr.bf16.mxu1 %v2406_v39 }
 0x27d   :  { %854 = vmatpush1.bf16.msra.mxu0 %v2408_v40  ;;  %895 = vmatpush1.bf16.msra.mxu1 %v2412_v41 }
 0x27e   :  { %855 = vmatprep.subr.bf16.mxu0 %v2424_v44  ;;  %896 = vmatprep.subr.bf16.mxu1 %v2426_v45 }
 0x281   :  { %856 = vmatpush1.bf16.msra.mxu0 %v2430_v46  ;;  %897 = vmatpush1.bf16.msra.mxu1 %v2432_v47 }
 0x282   :  { %857 = vmatprep.subr.bf16.mxu0 %v2434_v49  ;;  %898 = vmatprep.subr.bf16.mxu1 %v2436_v50 }
 0x285   :  { %858 = vmatpush1.bf16.msra.mxu0 %v2442_v51  ;;  %899 = vmatpush1.bf16.msra.mxu1 %v2444_v52 }
 0x286   :  { %954 = vmatprep.subr.bf16.mxu0 %v2326_v11  ;;  %995 = vmatprep.subr.bf16.mxu1 %v2328_v13 }
 0x33b   :  { %v766_v53 = vpop.f32.mrb[24].mxu0  ;;  %v807_v6 = vpop.f32.mrb[24].mxu1 }
 0x33c   :  { %v814_v24 = vadd.f32 %v766_v53, %v2515_v31  ;;  %v816_v61 = vadd.f32 %v807_v6, %v2518_v35  ;;  %v768_v60 = vpop.f32.mrb[25].mxu0  ;;  %v809_v62 = vpop.f32.mrb[25].mxu1 }
 0x33d   :  { %v815_v1 = vadd.f32 %v768_v60, %v2520_v43  ;;  %v817_v2 = vadd.f32 %v809_v62, %v2997_v63  ;;  %v770_v0 = vpop.f32.mrb[26].mxu0  ;;  %v811_v3 = vpop.f32.mrb[26].mxu1 }
 0x33e   :  { %v1757_v4 = vmul.f32 -1.442695, %v814_v24  ;;  %v771_v10 = vpop.f32.mrb[27].mxu0  ;;  %v812_v55 = vpop.f32.mrb[27].mxu1 }
 0x33f   :  { %v1758_v7 = vmul.f32 -1.442695, %v815_v1  ;;  %v1759_v9 = vmul.f32 -1.442695, %v817_v2 }
 0x340   :  { %1985 = vpow2.f32 %v1757_v4 }
 0x341   :  { %1987 = vpow2.f32 %v1758_v7 }
 0x342   :  { %1989 = vpow2.f32 %v1759_v9 }
 0x343   :  { %1991 = vtanh.f32 %v816_v61  ;;  %v3001_v61 = vld [vmem:[#allocation13_spill] sm:$0xff] }
 0x34a   :  { %v1986_v12 = vpop.eup %1985 }
 0x34b   :  { %v1988_v42 = vpop.eup %1987  ;;  %v821_v31 = vadd.f32 1.0, %v1986_v12 }
 0x34c   :  { %v827_v35 = vadd.f32 1.0, %v1988_v42  ;;  %v1990_v43 = vpop.eup %1989 }
 0x34d   :  { %1993 = vrcp.f32 %v821_v31  ;;  %v1992_v20 = vpop.eup %1991  ;;  %v834_v56 = vadd.f32 1.0, %v1990_v43 }
 0x34e   :  { %1995 = vrcp.f32 %v827_v35 }
 0x34f   :  { %1997 = vrcp.f32 %v834_v56 }
 0x357   :  { %v1994_v8 = vpop.eup %1993 }
 0x358   :  { %v1996_v57 = vpop.eup %1995  ;;  %v838_v32 = vmul.f32 %v1994_v8, %v1992_v20 }
 0x359   :  { %v837_v59 = vmul.f32 %v1996_v57, %v2621_v21  ;;  %v1998_v54 = vpop.eup %1997  ;;  %v3000_v21 = vld [vmem:[#allocation12_spill] sm:$0xff] }
 0x35b   :  { %v2663_v48 = vadd.f32 %v838_v32, %v837_v59  ;;  %v2708_v59 = vld [vmem:[#allocation2] ss:$16 sps:$4 sm:$0xff]  }
 0x35d   :  { %1999 = vtanh.f32 %v2663_v48 }
 0x367   :  { %v2000_v58 = vpop.eup %1999 }
 0x368   :  { %v841_v53 = vmul.f32 %v2000_v58, %v1998_v54  ;;  %v2711_v54 = vld [vmem:[#allocation2 + $0x8] ss:$16 sps:$4 sm:$0xff]   ;;  %v2717_v58 = vld [vmem:[#allocation2 + $0x2c] ss:$16 sps:$4 sm:$0xff]  }
 0x36a   :  { %v842_v6 = vpack.c.bf16 %v841_v53, %v841_v53  ;;  %v2722_v53 = vld [vmem:[#allocation2 + $0x20] ss:$16 sps:$4 sm:$0xff]  }
 0x36c   :  { %876 = vmatmul.mubr.bf16.vlgmr.msra.gmra.mrb[28].mxu0 %v842_v6  ;;  %917 = vmatmul.mubr.bf16.vlgmr.msra.gmra.mrb[28].mxu1 %v842_v6  ;;  %v2725_v6 = vld [vmem:[#allocation2 + $0x28] ss:$16 sps:$4 sm:$0xff]  }
 0x36d   :  { %955 = vmatpush1.bf16.msra.mxu0 %v2330_v14  ;;  %996 = vmatpush1.bf16.msra.mxu1 %v2332_v15 }
 0x36e   :  { %956 = vmatprep.subr.bf16.mxu0 %v2336_v16  ;;  %997 = vmatprep.subr.bf16.mxu1 %v2338_v17  ;;  %v2998_v16 = vld [vmem:[#allocation10_spill] sm:$0xff] }
 0x36f   :  { %986 = vmatprep.mubr.bf16.mxu0 %v2996_v5  ;;  %1027 = vmatprep.mubr.bf16.mxu1 %v2996_v5 }
 0x371   :  { %957 = vmatpush1.bf16.msra.mxu0 %v2340_v18  ;;  %998 = vmatpush1.bf16.msra.mxu1 %v2344_v19  ;;  %v2999_v18 = vld [vmem:[#allocation11_spill] sm:$0xff] }
 0x372   :  { %958 = vmatprep.subr.bf16.mxu0 %v2354_v22  ;;  %999 = vmatprep.subr.bf16.mxu1 %v2358_v23 }
 0x375   :  { %959 = vmatpush1.bf16.msra.mxu0 %v2364_v25  ;;  %1000 = vmatpush1.bf16.msra.mxu1 %v2366_v26 }
 0x376   :  { %960 = vmatprep.subr.bf16.mxu0 %v2370_v27  ;;  %1001 = vmatprep.subr.bf16.mxu1 %v2372_v28 }
 0x379   :  { %961 = vmatpush1.bf16.msra.mxu0 %v2374_v29  ;;  %1002 = vmatpush1.bf16.msra.mxu1 %v2376_v30 }
 0x37a   :  { %962 = vmatprep.subr.bf16.mxu0 %v2388_v33  ;;  %1003 = vmatprep.subr.bf16.mxu1 %v2392_v34 }
 0x37d   :  { %963 = vmatpush1.bf16.msra.mxu0 %v2396_v36  ;;  %1004 = vmatpush1.bf16.msra.mxu1 %v2398_v37 }
 0x37e   :  { %964 = vmatprep.subr.bf16.mxu0 %v2402_v38  ;;  %1005 = vmatprep.subr.bf16.mxu1 %v2406_v39 }
 0x381   :  { %965 = vmatpush1.bf16.msra.mxu0 %v2408_v40  ;;  %1006 = vmatpush1.bf16.msra.mxu1 %v2412_v41 }
 0x382   :  { %966 = vmatprep.subr.bf16.mxu0 %v2424_v44  ;;  %1007 = vmatprep.subr.bf16.mxu1 %v2426_v45 }
 0x385   :  { %967 = vmatpush1.bf16.msra.mxu0 %v2430_v46  ;;  %1008 = vmatpush1.bf16.msra.mxu1 %v2432_v47 }
 0x386   :  { %968 = vmatprep.subr.bf16.mxu0 %v2434_v49  ;;  %1009 = vmatprep.subr.bf16.mxu1 %v2436_v50 }
 0x389   :  { %969 = vmatpush1.bf16.msra.mxu0 %v2442_v51  ;;  %1010 = vmatpush1.bf16.msra.mxu1 %v2444_v52 }
 0x38a   :  { %1065 = vmatprep.subr.bf16.mxu0 %v2326_v11  ;;  %1106 = vmatprep.subr.bf16.mxu1 %v2328_v13 }
 0x43f   :  { %v877_v14 = vpop.f32.mrb[28].mxu0  ;;  %v918_v15 = vpop.f32.mrb[28].mxu1 }
 0x440   :  { %v925_v17 = vadd.f32 %v877_v14, %v2998_v16  ;;  %v927_v19 = vadd.f32 %v918_v15, %v2999_v18  ;;  %v879_v22 = vpop.f32.mrb[29].mxu0  ;;  %v920_v23 = vpop.f32.mrb[29].mxu1  ;;  %v2728_v14 = vld [vmem:[#allocation2 + $0x44] ss:$16 sps:$4 sm:$0xff]   ;;  %v2731_v15 = vld [vmem:[#allocation2 + $0x4c] ss:$16 sps:$4 sm:$0xff]  }
 0x441   :  { %v926_v24 = vadd.f32 %v879_v22, %v3000_v21  ;;  %v928_v60 = vadd.f32 %v920_v23, %v3001_v61  ;;  %v881_v62 = vpop.f32.mrb[30].mxu0  ;;  %v922_v1 = vpop.f32.mrb[30].mxu1 }
 0x442   :  { %v1760_v63 = vmul.f32 -1.442695, %v925_v17  ;;  %v882_v2 = vpop.f32.mrb[31].mxu0  ;;  %v923_v0 = vpop.f32.mrb[31].mxu1 }
 0x443   :  { %v1761_v11 = vmul.f32 -1.442695, %v926_v24  ;;  %v1762_v13 = vmul.f32 -1.442695, %v928_v60 }
 0x444   :  { %2001 = vpow2.f32 %v1760_v63 }
 0x445   :  { %2003 = vpow2.f32 %v1761_v11  ;;  %v2780_v11 = vld [vmem:[#allocation2 + $0x40] ss:$16 sps:$4 sm:$0xff]  }
 0x446   :  { %2005 = vpow2.f32 %v1762_v13  ;;  %v2783_v13 = vld [vmem:[#allocation2 + $0x48] ss:$16 sps:$4 sm:$0xff]  }
 0x447   :  { %2007 = vtanh.f32 %v927_v19 }
 0x44e   :  { %v2002_v3 = vpop.eup %2001 }
 0x44f   :  { %v2004_v4 = vpop.eup %2003  ;;  %v932_v10 = vadd.f32 1.0, %v2002_v3  ;;  %v2786_v3 = vld [vmem:[#allocation2 + $0x64] ss:$16 sps:$4 sm:$0xff]  }
 0x450   :  { %v938_v55 = vadd.f32 1.0, %v2004_v4  ;;  %v2006_v7 = vpop.eup %2005  ;;  %v2789_v4 = vld [vmem:[#allocation2 + $0x6c] ss:$16 sps:$4 sm:$0xff]  }
 0x451   :  { %2009 = vrcp.f32 %v932_v10  ;;  %v2008_v9 = vpop.eup %2007  ;;  %v945_v35 = vadd.f32 1.0, %v2006_v7  ;;  %v2792_v10 = vld [vmem:[#allocation2 + $0x60] ss:$16 sps:$4 sm:$0xff]   ;;  %v2798_v7 = vld [vmem:[#allocation2 + $0x84] ss:$16 sps:$4 sm:$0xff]  }
 0x452   :  { %2011 = vrcp.f32 %v938_v55  ;;  %v2795_v55 = vld [vmem:[#allocation2 + $0x68] ss:$16 sps:$4 sm:$0xff]  }
 0x453   :  { %2013 = vrcp.f32 %v945_v35  ;;  %v2813_v35 = vld [vmem:[#allocation2 + $0xac] ss:$16 sps:$4 sm:$0xff]  }
 0x45b   :  { %v2010_v12 = vpop.eup %2009 }
 0x45c   :  { %v2012_v42 = vpop.eup %2011  ;;  %v949_v31 = vmul.f32 %v2010_v12, %v2008_v9  ;;  %v2801_v9 = vld [vmem:[#allocation2 + $0x8c] ss:$16 sps:$4 sm:$0xff]   ;;  %v2804_v12 = vld [vmem:[#allocation2 + $0x80] ss:$16 sps:$4 sm:$0xff]  }
 0x45d   :  { %v948_v43 = vmul.f32 %v2012_v42, %v2663_v48  ;;  %v2014_v8 = vpop.eup %2013  ;;  %v2714_v48 = vld [vmem:[#allocation2 + $0x24] ss:$16 sps:$4 sm:$0xff]   ;;  %v2807_v42 = vld [vmem:[#allocation2 + $0x88] ss:$16 sps:$4 sm:$0xff]  }
 0x45f   :  { %v2705_v20 = vadd.f32 %v949_v31, %v948_v43  ;;  %v2810_v31 = vld [vmem:[#allocation2 + $0xa4] ss:$16 sps:$4 sm:$0xff]   ;;  %v2816_v43 = vld [vmem:[#allocation2 + $0xa0] ss:$16 sps:$4 sm:$0xff]  }
 0x461   :  { %2015 = vtanh.f32 %v2705_v20 }
 0x46b   :  { %v2016_v57 = vpop.eup %2015 }
 0x46c   :  { %v952_v32 = vmul.f32 %v2016_v57, %v2014_v8  ;;  %v2822_v8 = vld [vmem:[#allocation2 + $0xc4] ss:$16 sps:$4 sm:$0xff]   ;;  %v2825_v57 = vld [vmem:[#allocation2 + $0xcc] ss:$16 sps:$4 sm:$0xff]  }
 0x46e   :  { %v953_v56 = vpack.c.bf16 %v952_v32, %v952_v32  ;;  %v2828_v32 = vld [vmem:[#allocation2 + $0xc0] ss:$16 sps:$4 sm:$0xff]  }
 0x470   :  { %987 = vmatmul.mubr.bf16.vlgmr.msra.gmra.mrb[32].mxu0 %v953_v56  ;;  %1028 = vmatmul.mubr.bf16.vlgmr.msra.gmra.mrb[32].mxu1 %v953_v56  ;;  %v2831_v56 = vld [vmem:[#allocation2 + $0xc8] ss:$16 sps:$4 sm:$0xff]  }
 0x471   :  { %1066 = vmatpush1.bf16.msra.mxu0 %v2708_v59  ;;  %1107 = vmatpush1.bf16.msra.mxu1 %v2711_v54 }
 0x472   :  { %1067 = vmatprep.subr.bf16.mxu0 %v2714_v48  ;;  %1108 = vmatprep.subr.bf16.mxu1 %v2717_v58 }
 0x473   :  { %1097 = vmatprep.mubr.bf16.mxu0 %v2996_v5  ;;  %1138 = vmatprep.mubr.bf16.mxu1 %v2996_v5 }
 0x475   :  { %1068 = vmatpush1.bf16.msra.mxu0 %v2722_v53  ;;  %1109 = vmatpush1.bf16.msra.mxu1 %v2725_v6 }
 0x476   :  { %1069 = vmatprep.subr.bf16.mxu0 %v2728_v14  ;;  %1110 = vmatprep.subr.bf16.mxu1 %v2731_v15 }
 0x479   :  { %1070 = vmatpush1.bf16.msra.mxu0 %v2364_v25  ;;  %1111 = vmatpush1.bf16.msra.mxu1 %v2366_v26  ;;  %v2756_v25 = vld [vmem:[#allocation2 + $0x4] ss:$16 sps:$4 sm:$0xff]   ;;  %v2759_v26 = vld [vmem:[#allocation2 + $0xc] ss:$16 sps:$4 sm:$0xff]  }
 0x47a   :  { %1071 = vmatprep.subr.bf16.mxu0 %v2370_v27  ;;  %1112 = vmatprep.subr.bf16.mxu1 %v2372_v28 }
 0x47d   :  { %1072 = vmatpush1.bf16.msra.mxu0 %v2374_v29  ;;  %1113 = vmatpush1.bf16.msra.mxu1 %v2376_v30  ;;  %v3002_v29 = vld [vmem:[#allocation14_spill] sm:$0xff] }
 0x47e   :  { %1073 = vmatprep.subr.bf16.mxu0 %v2388_v33  ;;  %1114 = vmatprep.subr.bf16.mxu1 %v2392_v34  ;;  %v3003_v33 = vld [vmem:[#allocation15_spill] sm:$0xff] }
 0x481   :  { %1074 = vmatpush1.bf16.msra.mxu0 %v2396_v36  ;;  %1115 = vmatpush1.bf16.msra.mxu1 %v2398_v37 }
 0x482   :  { %1075 = vmatprep.subr.bf16.mxu0 %v2402_v38  ;;  %1116 = vmatprep.subr.bf16.mxu1 %v2406_v39  ;;  %v3004_v38 = vld [vmem:[#allocation16_spill] sm:$0xff] }
 0x485   :  { %1076 = vmatpush1.bf16.msra.mxu0 %v2408_v40  ;;  %1117 = vmatpush1.bf16.msra.mxu1 %v2412_v41  ;;  %v3005_v40 = vld [vmem:[#allocation17_spill] sm:$0xff] }
 0x486   :  { %1077 = vmatprep.subr.bf16.mxu0 %v2424_v44  ;;  %1118 = vmatprep.subr.bf16.mxu1 %v2426_v45 }
 0x489   :  { %1078 = vmatpush1.bf16.msra.mxu0 %v2430_v46  ;;  %1119 = vmatpush1.bf16.msra.mxu1 %v2432_v47 }
 0x48a   :  { %1079 = vmatprep.subr.bf16.mxu0 %v2434_v49  ;;  %1120 = vmatprep.subr.bf16.mxu1 %v2436_v50 }
 0x48d   :  { %1080 = vmatpush1.bf16.msra.mxu0 %v2442_v51  ;;  %1121 = vmatpush1.bf16.msra.mxu1 %v2444_v52 }
 0x48e   :  { %1176 = vmatprep.subr.bf16.mxu0 %v2756_v25  ;;  %1217 = vmatprep.subr.bf16.mxu1 %v2759_v26 }
 0x543   :  { %v988_v27 = vpop.f32.mrb[32].mxu0  ;;  %v1029_v28 = vpop.f32.mrb[32].mxu1 }
 0x544   :  { %v1036_v30 = vadd.f32 %v988_v27, %v3002_v29  ;;  %v1038_v34 = vadd.f32 %v1029_v28, %v3003_v33  ;;  %v990_v36 = vpop.f32.mrb[33].mxu0  ;;  %v1031_v37 = vpop.f32.mrb[33].mxu1  ;;  %v2834_v27 = vld [vmem:[#allocation2 + $0xe4] ss:$16 sps:$4 sm:$0xff]   ;;  %v2837_v28 = vld [vmem:[#allocation2 + $0xec] ss:$16 sps:$4 sm:$0xff]  }
 0x545   :  { %v1037_v39 = vadd.f32 %v990_v36, %v3004_v38  ;;  %v1039_v41 = vadd.f32 %v1031_v37, %v3005_v40  ;;  %v992_v44 = vpop.f32.mrb[34].mxu0  ;;  %v1033_v45 = vpop.f32.mrb[34].mxu1  ;;  %v2840_v29 = vld [vmem:[#allocation2 + $0xe0] ss:$16 sps:$4 sm:$0xff]   ;;  %v3006_v36 = vld [vmem:[#allocation18_spill] sm:$0xff] }
 0x546   :  { %v1763_v46 = vmul.f32 -1.442695, %v1036_v30  ;;  %v993_v47 = vpop.f32.mrb[35].mxu0  ;;  %v1034_v49 = vpop.f32.mrb[35].mxu1  ;;  %v2843_v30 = vld [vmem:[#allocation2 + $0xe8] ss:$16 sps:$4 sm:$0xff]  }
 0x547   :  { %v1764_v50 = vmul.f32 -1.442695, %v1037_v39  ;;  %v1765_v51 = vmul.f32 -1.442695, %v1039_v41  ;;  %v3007_v38 = vld [vmem:[#allocation19_spill] sm:$0xff]  ;;  %v3008_v44 = vld [vmem:[#allocation20_spill] sm:$0xff] }
 0x548   :  { %2017 = vpow2.f32 %v1763_v46  ;;  %v3009_v46 = vld [vmem:[#allocation21_spill] sm:$0xff] }
 0x549   :  { %2019 = vpow2.f32 %v1764_v50 }
 0x54a   :  { %2021 = vpow2.f32 %v1765_v51 }
 0x54b   :  { %2023 = vtanh.f32 %v1038_v34 }
 0x552   :  { %v2018_v52 = vpop.eup %2017 }
 0x553   :  { %v2020_v16 = vpop.eup %2019  ;;  %v1043_v17 = vadd.f32 1.0, %v2018_v52 }
 0x554   :  { %v1049_v18 = vadd.f32 1.0, %v2020_v16  ;;  %v2022_v19 = vpop.eup %2021 }
 0x555   :  { %2025 = vrcp.f32 %v1043_v17  ;;  %v2024_v22 = vpop.eup %2023  ;;  %v1056_v61 = vadd.f32 1.0, %v2022_v19 }
 0x556   :  { %2027 = vrcp.f32 %v1049_v18 }
 0x557   :  { %2029 = vrcp.f32 %v1056_v61 }
 0x55f   :  { %v2026_v23 = vpop.eup %2025 }
 0x560   :  { %v2028_v21 = vpop.eup %2027  ;;  %v1060_v24 = vmul.f32 %v2026_v23, %v2024_v22 }
 0x561   :  { %v1059_v60 = vmul.f32 %v2028_v21, %v2705_v20  ;;  %v2030_v1 = vpop.eup %2029  ;;  %v2819_v20 = vld [vmem:[#allocation2 + $0xa8] ss:$16 sps:$4 sm:$0xff]  }
 0x563   :  { %v2767_v62 = vadd.f32 %v1060_v24, %v1059_v60 }
 0x565   :  { %2031 = vtanh.f32 %v2767_v62 }
 0x56f   :  { %v2032_v63 = vpop.eup %2031 }
 0x570   :  { %v1063_v2 = vmul.f32 %v2032_v63, %v2030_v1 }
 0x572   :  { %v1064_v0 = vpack.c.bf16 %v1063_v2, %v1063_v2 }
 0x574   :  { %1098 = vmatmul.mubr.bf16.vlgmr.msra.gmra.mrb[36].mxu0 %v1064_v0  ;;  %1139 = vmatmul.mubr.bf16.vlgmr.msra.gmra.mrb[36].mxu1 %v1064_v0 }
 0x575   :  { %1177 = vmatpush1.bf16.msra.mxu0 %v2708_v59  ;;  %1218 = vmatpush1.bf16.msra.mxu1 %v2711_v54 }
 0x576   :  { %1178 = vmatprep.subr.bf16.mxu0 %v2714_v48  ;;  %1219 = vmatprep.subr.bf16.mxu1 %v2717_v58 }
 0x577   :  { %1208 = vmatprep.mubr.bf16.mxu0 %v2996_v5  ;;  %1249 = vmatprep.mubr.bf16.mxu1 %v2996_v5 }
 0x579   :  { %1179 = vmatpush1.bf16.msra.mxu0 %v2722_v53  ;;  %1220 = vmatpush1.bf16.msra.mxu1 %v2725_v6 }
 0x57a   :  { %1180 = vmatprep.subr.bf16.mxu0 %v2728_v14  ;;  %1221 = vmatprep.subr.bf16.mxu1 %v2731_v15 }
 0x57d   :  { %1181 = vmatpush1.bf16.msra.mxu0 %v2780_v11  ;;  %1222 = vmatpush1.bf16.msra.mxu1 %v2783_v13 }
 0x57e   :  { %1182 = vmatprep.subr.bf16.mxu0 %v2786_v3  ;;  %1223 = vmatprep.subr.bf16.mxu1 %v2789_v4 }
 0x581   :  { %1183 = vmatpush1.bf16.msra.mxu0 %v2792_v10  ;;  %1224 = vmatpush1.bf16.msra.mxu1 %v2795_v55 }
 0x582   :  { %1184 = vmatprep.subr.bf16.mxu0 %v2798_v7  ;;  %1225 = vmatprep.subr.bf16.mxu1 %v2801_v9 }
 0x585   :  { %1185 = vmatpush1.bf16.msra.mxu0 %v2804_v12  ;;  %1226 = vmatpush1.bf16.msra.mxu1 %v2807_v42 }
 0x586   :  { %1186 = vmatprep.subr.bf16.mxu0 %v2810_v31  ;;  %1227 = vmatprep.subr.bf16.mxu1 %v2813_v35 }
 0x589   :  { %1187 = vmatpush1.bf16.msra.mxu0 %v2816_v43  ;;  %1228 = vmatpush1.bf16.msra.mxu1 %v2819_v20 }
 0x58a   :  { %1188 = vmatprep.subr.bf16.mxu0 %v2822_v8  ;;  %1229 = vmatprep.subr.bf16.mxu1 %v2825_v57 }
 0x58d   :  { %1189 = vmatpush1.bf16.msra.mxu0 %v2828_v32  ;;  %1230 = vmatpush1.bf16.msra.mxu1 %v2831_v56 }
 0x58e   :  { %1190 = vmatprep.subr.bf16.mxu0 %v2834_v27  ;;  %1231 = vmatprep.subr.bf16.mxu1 %v2837_v28 }
 0x591   :  { %1191 = vmatpush1.bf16.msra.mxu0 %v2840_v29  ;;  %1232 = vmatpush1.bf16.msra.mxu1 %v2843_v30 }
 0x592   :  { %1287 = vmatprep.subr.bf16.mxu0 %v2756_v25  ;;  %1328 = vmatprep.subr.bf16.mxu1 %v2759_v26 }
 0x647   :  { %v1099_v33 = vpop.f32.mrb[36].mxu0  ;;  %v1140_v34 = vpop.f32.mrb[36].mxu1 }
 0x648   :  { %v1147_v37 = vadd.f32 %v1099_v33, %v3006_v36  ;;  %v1149_v39 = vadd.f32 %v1140_v34, %v3007_v38  ;;  %v1101_v40 = vpop.f32.mrb[37].mxu0  ;;  %v1142_v41 = vpop.f32.mrb[37].mxu1 }
 0x649   :  { %v1148_v45 = vadd.f32 %v1101_v40, %v3008_v44  ;;  %v1150_v47 = vadd.f32 %v1142_v41, %v3009_v46  ;;  %v1103_v49 = vpop.f32.mrb[38].mxu0  ;;  %v1144_v50 = vpop.f32.mrb[38].mxu1  ;;  %v1935_v40 = vld [vmem:[%s2967_s5] sm:$0xff]   ;;  %v2195_v41 = vmov 0.0   ;;  %v1936_v44 = vld [vmem:[%s2967_s5 + $0x8] sm:$0xff]   ;;  %v1938_v46 = vld [vmem:[%s2967_s5 + $0x18] sm:$0xff]  }
 0x64a   :  { %v1766_v51 = vmul.f32 -1.442695, %v1147_v37  ;;  %v1104_v52 = vpop.f32.mrb[39].mxu0  ;;  %v1145_v16 = vpop.f32.mrb[39].mxu1  ;;  %v1941_v49 = vld [vmem:[#allocation4] sm:$0xff]   ;;  %v1940_v50 = vld [vmem:[%s2967_s5 + $0x28] sm:$0xff]  }
 0x64b   :  { %v1767_v25 = vmul.f32 -1.442695, %v1148_v45  ;;  %v1768_v26 = vmul.f32 -1.442695, %v1150_v47  ;;  %v1937_v45 = vld [vmem:[%s2967_s5 + $0x10] sm:$0xff]   ;;  %v1939_v47 = vld [vmem:[%s2967_s5 + $0x20] sm:$0xff]  }
 0x64c   :  { %2033 = vpow2.f32 %v1766_v51  ;;  %v1943_v51 = vld [vmem:[#allocation4 + $0x8] sm:$0xff]   ;;  %v1414_v52 = vld [vmem:[%s2963_s1] sm:$0xff]  ;;  %v1942_v16 = vld [vmem:[%s2967_s5 + $0x30] sm:$0xff]  }
 0x64d   :  { %2035 = vpow2.f32 %v1767_v25  ;;  %v1415_v25 = vpack.c.bf16 %v1414_v52, %v1414_v52 }
 0x64e   :  { %2037 = vpow2.f32 %v1768_v26  ;;  %v1944_v26 = vld [vmem:[%s2967_s5 + $0x38] sm:$0xff]  }
 0x64f   :  { %2039 = vtanh.f32 %v1149_v39 }
 0x656   :  { %v2034_v17 = vpop.eup %2033 }
 0x657   :  { %v2036_v18 = vpop.eup %2035  ;;  %v1154_v19 = vadd.f32 1.0, %v2034_v17  ;;  %v1945_v17 = vld [vmem:[#allocation6] sm:$0xff]  }
 0x658   :  { %v1160_v22 = vadd.f32 1.0, %v2036_v18  ;;  %v2038_v23 = vpop.eup %2037  ;;  %v1946_v18 = vld [vmem:[#allocation6 + $0x8] sm:$0xff]  }
 0x659   :  { %2041 = vrcp.f32 %v1154_v19  ;;  %v2040_v21 = vpop.eup %2039  ;;  %v1167_v1 = vadd.f32 1.0, %v2038_v23  ;;  %v1947_v19 = vld [vmem:[#allocation6 + $0x10] sm:$0xff]   ;;  %v1949_v23 = vld [vmem:[#allocation6 + $0x20] sm:$0xff]  }
 0x65a   :  { %2043 = vrcp.f32 %v1160_v22  ;;  %v1948_v22 = vld [vmem:[#allocation6 + $0x18] sm:$0xff]  }
 0x65b   :  { %2045 = vrcp.f32 %v1167_v1 }
 0x663   :  { %v2042_v24 = vpop.eup %2041 }
 0x664   :  { %v2044_v61 = vpop.eup %2043  ;;  %v1171_v60 = vmul.f32 %v2042_v24, %v2040_v21  ;;  %v1950_v21 = vld [vmem:[#allocation6 + $0x28] sm:$0xff]  }
 0x665   :  { %v1170_v63 = vmul.f32 %v2044_v61, %v2767_v62  ;;  %v2046_v0 = vpop.eup %2045 }
 0x667   :  { %v2853_v2 = vadd.f32 %v1171_v60, %v1170_v63  ;;  %v3014_v60 = vld [vmem:[#allocation26_spill] sm:$0xff]  ;;  %v3015_v63 = vld [vmem:[#allocation27_spill] sm:$0xff] }
 0x669   :  { %2047 = vtanh.f32 %v2853_v2 }
 0x673   :  { %v2048_v33 = vpop.eup %2047 }
 0x674   :  { %v1174_v34 = vmul.f32 %v2048_v33, %v2046_v0 }
 0x676   :  { %v1175_v36 = vpack.c.bf16 %v1174_v34, %v1174_v34  ;;  %v3016_v34 = vld [vmem:[#allocation28_spill] sm:$0xff] }
 0x678   :  { %1209 = vmatmul.mubr.bf16.vlgmr.msra.gmra.mrb[40].mxu0 %v1175_v36  ;;  %1250 = vmatmul.mubr.bf16.vlgmr.msra.gmra.mrb[40].mxu1 %v1175_v36 }
 0x679   :  { %1288 = vmatpush1.bf16.msra.mxu0 %v2708_v59  ;;  %1329 = vmatpush1.bf16.msra.mxu1 %v2711_v54  ;;  %v3010_v54 = vld [vmem:[#allocation22_spill] sm:$0xff] }
 0x67a   :  { %1289 = vmatprep.subr.bf16.mxu0 %v2714_v48  ;;  %1330 = vmatprep.subr.bf16.mxu1 %v2717_v58  ;;  %v3011_v58 = vld [vmem:[#allocation23_spill] sm:$0xff] }
 0x67b   :  { %1319 = vmatprep.mubr.bf16.mxu0 %v2996_v5  ;;  %1360 = vmatprep.mubr.bf16.mxu1 %v2996_v5 }
 0x67d   :  { %1290 = vmatpush1.bf16.msra.mxu0 %v2722_v53  ;;  %1331 = vmatpush1.bf16.msra.mxu1 %v2725_v6 }
 0x67e   :  { %1291 = vmatprep.subr.bf16.mxu0 %v2728_v14  ;;  %1332 = vmatprep.subr.bf16.mxu1 %v2731_v15  ;;  %v3012_v15 = vld [vmem:[#allocation24_spill] sm:$0xff] }
 0x681   :  { %1292 = vmatpush1.bf16.msra.mxu0 %v2780_v11  ;;  %1333 = vmatpush1.bf16.msra.mxu1 %v2783_v13  ;;  %v3013_v11 = vld [vmem:[#allocation25_spill] sm:$0xff] }
 0x682   :  { %1293 = vmatprep.subr.bf16.mxu0 %v2786_v3  ;;  %1334 = vmatprep.subr.bf16.mxu1 %v2789_v4 }
 0x685   :  { %1294 = vmatpush1.bf16.msra.mxu0 %v2792_v10  ;;  %1335 = vmatpush1.bf16.msra.mxu1 %v2795_v55 }
 0x686   :  { %1295 = vmatprep.subr.bf16.mxu0 %v2798_v7  ;;  %1336 = vmatprep.subr.bf16.mxu1 %v2801_v9 }
 0x689   :  { %1296 = vmatpush1.bf16.msra.mxu0 %v2804_v12  ;;  %1337 = vmatpush1.bf16.msra.mxu1 %v2807_v42 }
 0x68a   :  { %1297 = vmatprep.subr.bf16.mxu0 %v2810_v31  ;;  %1338 = vmatprep.subr.bf16.mxu1 %v2813_v35 }
 0x68d   :  { %1298 = vmatpush1.bf16.msra.mxu0 %v2816_v43  ;;  %1339 = vmatpush1.bf16.msra.mxu1 %v2819_v20 }
 0x68e   :  { %1299 = vmatprep.subr.bf16.mxu0 %v2822_v8  ;;  %1340 = vmatprep.subr.bf16.mxu1 %v2825_v57 }
 0x691   :  { %1300 = vmatpush1.bf16.msra.mxu0 %v2828_v32  ;;  %1341 = vmatpush1.bf16.msra.mxu1 %v2831_v56 }
 0x692   :  { %1301 = vmatprep.subr.bf16.mxu0 %v2834_v27  ;;  %1342 = vmatprep.subr.bf16.mxu1 %v2837_v28 }
 0x695   :  { %1302 = vmatpush1.bf16.msra.mxu0 %v2840_v29  ;;  %1343 = vmatpush1.bf16.msra.mxu1 %v2843_v30 }
 0x696   :  { %1825 = vmatprep.subr.bf16.mxu1 %v2195_v41  ;;  %1817 = vmatprep.subr.bf16.mxu0 %v2195_v41 }
 0x74b   :  { %v1210_v5 = vpop.f32.mrb[40].mxu0  ;;  %v1251_v59 = vpop.f32.mrb[40].mxu1 }
 0x74c   :  { %v1258_v48 = vadd.f32 %v1210_v5, %v3010_v54  ;;  %v1260_v53 = vadd.f32 %v1251_v59, %v3011_v58  ;;  %v1212_v6 = vpop.f32.mrb[41].mxu0  ;;  %v1253_v14 = vpop.f32.mrb[41].mxu1  ;;  %v3017_v5 = vld [vmem:[#allocation29_spill] sm:$0xff] }
 0x74d   :  { %v1259_v62 = vadd.f32 %v1212_v6, %v3012_v15  ;;  %v1261_v13 = vadd.f32 %v1253_v14, %v3013_v11  ;;  %v1214_v3 = vpop.f32.mrb[42].mxu0  ;;  %v1255_v4 = vpop.f32.mrb[42].mxu1 }
 0x74e   :  { %v1769_v10 = vmul.f32 -1.442695, %v1258_v48  ;;  %v1215_v55 = vpop.f32.mrb[43].mxu0  ;;  %v1256_v7 = vpop.f32.mrb[43].mxu1 }
 0x74f   :  { %v1770_v9 = vmul.f32 -1.442695, %v1259_v62  ;;  %v1771_v12 = vmul.f32 -1.442695, %v1261_v13 }
 0x750   :  { %2049 = vpow2.f32 %v1769_v10 }
 0x751   :  { %2051 = vpow2.f32 %v1770_v9 }
 0x752   :  { %2053 = vpow2.f32 %v1771_v12 }
 0x753   :  { %2055 = vtanh.f32 %v1260_v53 }
 0x75a   :  { %v2050_v42 = vpop.eup %2049 }
 0x75b   :  { %v2052_v31 = vpop.eup %2051  ;;  %v1265_v35 = vadd.f32 1.0, %v2050_v42 }
 0x75c   :  { %v1271_v43 = vadd.f32 1.0, %v2052_v31  ;;  %v2054_v20 = vpop.eup %2053 }
 0x75d   :  { %2057 = vrcp.f32 %v1265_v35  ;;  %v2056_v8 = vpop.eup %2055  ;;  %v1278_v27 = vadd.f32 1.0, %v2054_v20 }
 0x75e   :  { %2059 = vrcp.f32 %v1271_v43 }
 0x75f   :  { %2061 = vrcp.f32 %v1278_v27 }
 0x767   :  { %v2058_v57 = vpop.eup %2057 }
 0x768   :  { %v2060_v32 = vpop.eup %2059  ;;  %v1282_v56 = vmul.f32 %v2058_v57, %v2056_v8 }
 0x769   :  { %v1281_v28 = vmul.f32 %v2060_v32, %v2853_v2  ;;  %v2062_v30 = vpop.eup %2061 }
 0x76b   :  { %v2893_v29 = vadd.f32 %v1282_v56, %v1281_v28  ;;  %v1951_v28 = vld [vmem:[#allocation6 + $0x30] sm:$0xff]  }
 0x76d   :  { %2063 = vtanh.f32 %v2893_v29 }
 0x777   :  { %v2064_v37 = vpop.eup %2063 }
 0x778   :  { %v1285_v38 = vmul.f32 %v2064_v37, %v2062_v30  ;;  %v1952_v30 = vld [vmem:[#allocation6 + $0x38] sm:$0xff]  }
 0x77a   :  { %v1286_v39 = vpack.c.bf16 %v1285_v38, %v1285_v38 }
 0x77c   :  { %1320 = vmatmul.mubr.bf16.vlgmr.msra.gmra.mrb[44].mxu0 %v1286_v39  ;;  %1361 = vmatmul.mubr.bf16.vlgmr.msra.gmra.mrb[44].mxu1 %v1286_v39 }
 0x77d   :  { %1826 = vmatpush3.bf16.msra.mxu1 %v1935_v40  ;;  %1821 = vmatprep.mubr.msk.bf16.mxu0 %vm2196_vm1, %v2195_v41 }
 0x77e   :  { %1827 = vmatprep.subr.bf16.mxu1 %v2195_v41  ;;  %1818 = vmatpush3.bf16.msra.mxu0 %v1941_v49  ;;  %v1787_v49 = vld [vmem:[%s2971_s9] ss:$0 sm:$0xff] }
 0x77f   :  { %1819 = vmatprep.subr.bf16.mxu0 %v2195_v41  ;;  %1841 = vmatprep.mubr.msk.bf16.mxu1 %vm2196_vm1, %v2195_v41 }
 0x781   :  { %1828 = vmatpush3.bf16.msra.mxu1 %v1936_v44 }
 0x782   :  { %1829 = vmatprep.subr.bf16.mxu1 %v2195_v41  ;;  %1820 = vmatpush3.bf16.msra.mxu0 %v1943_v51 }
 0x783   :  { %1845 = vmatprep.subr.bf16.mxu0 %v2195_v41 }
 0x785   :  { %1830 = vmatpush3.bf16.msra.mxu1 %v1937_v45  ;;  %1822 = vmatmul.mubr.msk.bf16.vlgmr.msra.gmra.mrb[48].mxu0 %vm191_vm0, %v1415_v25 }
 0x786   :  { %1831 = vmatprep.subr.bf16.mxu1 %v2195_v41  ;;  %1861 = vmatprep.mubr.msk.bf16.mxu0 %vm2196_vm1, %v2195_v41 }
 0x787   :  { %1846 = vmatpush3.bf16.msra.mxu0 %v1945_v17 }
 0x788   :  { %1847 = vmatprep.subr.bf16.mxu0 %v2195_v41 }
 0x789   :  { %1832 = vmatpush3.bf16.msra.mxu1 %v1938_v46 }
 0x78a   :  { %1833 = vmatprep.subr.bf16.mxu1 %v2195_v41 }
 0x78b   :  { %1848 = vmatpush3.bf16.msra.mxu0 %v1946_v18 }
 0x78c   :  { %1849 = vmatprep.subr.bf16.mxu0 %v2195_v41 }
 0x78d   :  { %1834 = vmatpush3.bf16.msra.mxu1 %v1939_v47 }
 0x78e   :  { %1835 = vmatprep.subr.bf16.mxu1 %v2195_v41 }
 0x78f   :  { %1850 = vmatpush3.bf16.msra.mxu0 %v1947_v19 }
 0x790   :  { %1851 = vmatprep.subr.bf16.mxu0 %v2195_v41 }
 0x791   :  { %1836 = vmatpush3.bf16.msra.mxu1 %v1940_v50 }
 0x792   :  { %1837 = vmatprep.subr.bf16.mxu1 %v2195_v41 }
 0x793   :  { %1852 = vmatpush3.bf16.msra.mxu0 %v1948_v22 }
 0x794   :  { %1853 = vmatprep.subr.bf16.mxu0 %v2195_v41 }
 0x795   :  { %1838 = vmatpush3.bf16.msra.mxu1 %v1942_v16 }
 0x796   :  { %1839 = vmatprep.subr.bf16.mxu1 %v2195_v41 }
 0x797   :  { %1854 = vmatpush3.bf16.msra.mxu0 %v1949_v23 }
 0x798   :  { %1855 = vmatprep.subr.bf16.mxu0 %v2195_v41 }
 0x799   :  { %1840 = vmatpush3.bf16.msra.mxu1 %v1944_v26 }
 0x79b   :  { %1856 = vmatpush3.bf16.msra.mxu0 %v1950_v21 }
 0x79c   :  { %1857 = vmatprep.subr.bf16.mxu0 %v2195_v41 }
 0x79f   :  { %1858 = vmatpush3.bf16.msra.mxu0 %v1951_v28 }
 0x7a0   :  { %1859 = vmatprep.subr.bf16.mxu0 %v2195_v41 }
 0x7a3   :  { %1860 = vmatpush3.bf16.msra.mxu0 %v1952_v30 }
 0x84f   :  { %v1321_v24 = vpop.f32.mrb[44].mxu0  ;;  %v1362_v61 = vpop.f32.mrb[44].mxu1 }
 0x850   :  { %v1369_v1 = vadd.f32 %v1321_v24, %v3014_v60  ;;  %v1371_v2 = vadd.f32 %v1362_v61, %v3015_v63  ;;  %v1323_v0 = vpop.f32.mrb[45].mxu0  ;;  %v1364_v33 = vpop.f32.mrb[45].mxu1 }
 0x851   :  { %v1370_v36 = vadd.f32 %v1323_v0, %v3016_v34  ;;  %v1372_v59 = vadd.f32 %v1364_v33, %v3017_v5  ;;  %v1325_v54 = vpop.f32.mrb[46].mxu0  ;;  %v1366_v48 = vpop.f32.mrb[46].mxu1 }
 0x852   :  { %v1772_v58 = vmul.f32 -1.442695, %v1369_v1  ;;  %v1326_v53 = vpop.f32.mrb[47].mxu0  ;;  %v1367_v6 = vpop.f32.mrb[47].mxu1 }
 0x853   :  { %v1773_v14 = vmul.f32 -1.442695, %v1370_v36  ;;  %v1774_v15 = vmul.f32 -1.442695, %v1372_v59 }
 0x854   :  { %2065 = vpow2.f32 %v1772_v58 }
 0x855   :  { %2067 = vpow2.f32 %v1773_v14 }
 0x856   :  { %2069 = vpow2.f32 %v1774_v15 }
 0x857   :  { %2071 = vtanh.f32 %v1371_v2 }
 0x858   :  { %v1469_v57 = vpop.f32.mrb[48].mxu0 }
 0x859   :  { %v1823_v32 = vpop.f32.mrb[49].mxu0 }
 0x85a   :  { %v1472_v56 = vpop.f32.mrb[50].mxu0 }
 0x85b   :  { %v1824_v27 = vpop.f32.mrb[51].mxu0 }
 0x85e   :  { %v2066_v62 = vpop.eup %2065 }
 0x85f   :  { %v2068_v11 = vpop.eup %2067  ;;  %v1376_v13 = vadd.f32 1.0, %v2066_v62 }
 0x860   :  { %v1382_v3 = vadd.f32 1.0, %v2068_v11  ;;  %v2070_v4 = vpop.eup %2069 }
 0x861   :  { %2073 = vrcp.f32 %v1376_v13  ;;  %v2072_v10 = vpop.eup %2071  ;;  %v1389_v12 = vadd.f32 1.0, %v2070_v4 }
 0x862   :  { %2075 = vrcp.f32 %v1382_v3 }
 0x863   :  { %2077 = vrcp.f32 %v1389_v12 }
 0x86b   :  { %v2074_v55 = vpop.eup %2073 }
 0x86c   :  { %v2076_v7 = vpop.eup %2075  ;;  %v1393_v9 = vmul.f32 %v2074_v55, %v2072_v10 }
 0x86d   :  { %v1392_v42 = vmul.f32 %v2076_v7, %v2893_v29  ;;  %v2078_v35 = vpop.eup %2077  ;;  %v1786_v29 = vld [vmem:[%s2969_s7] ss:$0 sm:$0xff] }
 0x86f   :  { %v1394_v31 = vadd.f32 %v1393_v9, %v1392_v42 }
 0x871   :  { %2079 = vtanh.f32 %v1394_v31 }
 0x87b   :  { %v2080_v43 = vpop.eup %2079 }
 0x87c   :  { %v1396_v20 = vmul.f32 %v2080_v43, %v2078_v35 }
 0x87e   :  { %v1397_v8 = vpack.c.bf16 %v1396_v20, %v1396_v20 }
 0x880   :  { %1842 = vmatmul.mubr.bf16.vlgmr.msra.gmra.mrb[48].mxu1 %v1397_v8 }
 0x953   :  { %v1557_v37 = vpop.f32.mrb[48].mxu1 }
 0x954   :  { %v1558_v38 = vadd.f32 %v1557_v37, %v1469_v57  ;;  %v1843_v39 = vpop.f32.mrb[49].mxu1 }
 0x955   :  { %v1560_v40 = vpop.f32.mrb[50].mxu1 }
 0x956   :  { %v1570_v44 = vadd.f32 %v1786_v29, %v1558_v38  ;;  %v1844_v45 = vpop.f32.mrb[51].mxu1 }
 0x958   :  { %v1571_v46 = vmax.f32 %v1570_v44, 0.0 }
 0x95a   :  { %v1572_v47 = vpack.c.bf16 %v1571_v46, %v1571_v46 }
 0x95c   :  { %1862 = vmatmul.mubr.bf16.vlgmr.msra.gmra.mrb[52].mxu0 %v1572_v47 }
 0xa2f   :  { %v1678_v41 = vpop.f32.mrb[52].mxu0 }
 0xa30   :  { %v1679_v50 = vadd.f32 %v1787_v49, %v1678_v41  ;;  %v1863_v51 = vpop.f32.mrb[53].mxu0 }
 0xa31   :  { %v1681_v52 = vpop.f32.mrb[54].mxu0 }
 0xa32   :  { %1684 = vmax.xlane.f32.xlu0 %v1679_v50  ;;  %v1864_v16 = vpop.f32.mrb[55].mxu0 }
 0xabf   :  { %v1685_v25 = vpop.xlane.xlu0 %1684 }
 0xac0   :  { %v1686_v26 = vsub.f32 %v1679_v50, %v1685_v25 }
 0xac2   :  { %v1687_v17 = vmul.f32 1.442695, %v1686_v26 }
 0xac4   :  { %2081 = vpow2.f32 %v1687_v17 }
 0xace   :  { %v2082_v18 = vpop.eup %2081 }
 0xacf   :  { %1689 = vadd.xlane.f32.xlu0 %v2082_v18 }
 0xb5c   :  { %v1690_v19 = vpop.xlane.xlu0 %1689 }
 0xb5d   :  { %2083 = vrcp.f32 %v1690_v19 }
 0xb67   :  { %v2084_v22 = vpop.eup %2083 }
 0xb68   :  { %v1692_v23 = vmul.f32 %v2084_v22, %v1690_v19 }
 0xb6a   :  { %v1693_v21 = vsub.f32 2.0, %v1692_v23 }
 0xb6c   :  { %v1694_v24 = vmul.f32 %v2084_v22, %v1693_v21 }
 0xb6e   :  { %v1695_v61 = vmul.f32 %v2082_v18, %v1694_v24 }
 0xb70   :  { %1696 = vst [vmem:[%s2972_s10] sm:$0xff] %v1695_v61 }
 0xb71   :  { %1701 = vsyncpa [#allocation3], 1 }
 0xb72   :  { %1702 = vsyncpa [#allocation5], 1 }

</bundles_post_ra>
